<compile_context>
chip_gen: v7x
topology: tpu7x:2x2x1
jax: 0.10.0
libtpu: 0.0.40
codegen_flags: <defaults>
</compile_context>

<pallas_src>
import jax
import jax.numpy as jnp
from jax import lax
from jax.experimental import pallas as pl
from jax.experimental.pallas import tpu as pltpu


# ---------------------------------------------------------------------------
# Wrapper-side weight preprocessing (tiny, runs once under jit)
# ---------------------------------------------------------------------------
def _upsample_matrix(w_up, W):
    """ConvTranspose2d(k=2, s=2) as one matmul.

    w_up: (2, 2, Cin, Chid).  Returns U of shape (W*Cin, 2*(2W)*Chid) such that
    row-flattened input rows (W*Cin) @ U give the upsampled image in pair-row
    layout: column a*(2W*Chid) + (2j+b)*Chid + d  ==  output pixel (2i+a, 2j+b, d).
    """
    Cin, Chid = w_up.shape[2], w_up.shape[3]
    eye_w = jnp.eye(W, dtype=w_up.dtype)
    halves = []
    for a in range(2):
        Ua = jnp.zeros((W * Cin, 2 * W * Chid), w_up.dtype)
        for b in range(2):
            sel = jnp.zeros((1, 2), w_up.dtype).at[0, b].set(1)
            place = jnp.kron(eye_w, sel)               # (W, 2W): [j, 2j+b] = 1
            Ua = Ua + jnp.kron(place, w_up[a, b])      # (W*Cin, 2W*Chid)
        halves.append(Ua)
    return jnp.concatenate(halves, axis=1)             # (W*Cin, 2*2W*Chid)


def _conv_pair_matrices(w3, W2):
    """3x3 / stride 1 / pad 1 conv on pair-row activations as 3 banded matmuls.

    w3: (3, 3, Cin, Cout).  Returns G of shape (3, 2*W2*Cin, 2*W2*Cout) so that
        out_pair[i] = sum_kY  P[i + kY] @ G[kY]
    where P is the pair-row activation padded with one zero pair-row on top and
    bottom.  Horizontal 'same' padding is folded into the band structure.
    """
    Cin, Cout = w3.shape[2], w3.shape[3]
    Xi, Xo = W2 * Cin, W2 * Cout
    mats = [jnp.zeros((2 * Xi, 2 * Xo), w3.dtype) for _ in range(3)]
    for ky in range(3):
        band = jnp.zeros((Xi, Xo), w3.dtype)
        for kx in range(3):
            # shift[m, q] = 1  iff  m == q + kx - 1  (input pixel feeding output q)
            shift = jnp.eye(W2, W2, k=1 - kx, dtype=w3.dtype)
            band = band + jnp.kron(shift, w3[ky, kx])
        for a in range(2):                       # parity of the output row in its pair
            t, s = divmod(a + ky - 1, 2)         # neighbouring pair-row / half within it
            mats[t + 1] = mats[t + 1].at[s * Xi:(s + 1) * Xi,
                                         a * Xo:(a + 1) * Xo].set(band)
    return jnp.stack(mats)                       # (3, 2*W2*Cin, 2*W2*Cout)


# ---------------------------------------------------------------------------
# Fused kernel: upsample + L x (ReLU -> conv3x3), all activations in VMEM
# ---------------------------------------------------------------------------
def _make_fused_kernel(n_layers, tb, H, W2, chans):
    M = tb * H   # matmul M dimension = rows of the whole batch tile

    def kernel(x_ref, u_ref, ub_ref, *args):
        g_refs = [args[2 * l] for l in range(n_layers)]
        b_refs = [args[2 * l + 1] for l in range(n_layers)]
        out_ref = args[2 * n_layers]

        # --- ConvTranspose2d(k=2, s=2): ONE bf16 MXU matmul, f32 accumulate.
        # Result lands directly in pair-row layout (no pixel shuffle).
        xin = x_ref[...].reshape(M, x_ref.shape[2])            # free reshape (H % 8 == 0)
        act = jnp.dot(xin.astype(jnp.bfloat16), u_ref[...],
                      preferred_element_type=jnp.float32)
        act = act + ub_ref[0, :]                               # (M, 2*W2*Chid) f32

        # Per-image row masks: vertical 'same' padding without a halo scratch,
        # and no bleeding between the images of one batch tile.
        row = lax.broadcasted_iota(jnp.int32, (M, 1), 0)
        not_first = (row % H) != 0
        not_last = (row % H) != (H - 1)

        # --- L x (ReLU -> Conv2d 3x3 pad=1), each as ONE wide matmul. ---
        for l in range(n_layers):
            cin_l, cout_l = chans[l]
            K = 2 * W2 * cin_l
            relu = jnp.maximum(act, 0.0)                       # f32 (v5e-safe)
            zrow = jnp.zeros((1, K), jnp.float32)
            prev = jnp.concatenate([zrow, relu[:M - 1, :]], axis=0)
            prev = jnp.where(not_first, prev, 0.0)             # zero above each image
            nxt = jnp.concatenate([relu[1:M, :], zrow], axis=0)
            nxt = jnp.where(not_last, nxt, 0.0)                # zero below each image
            pcat = jnp.concatenate([prev, relu, nxt], axis=1)  # (M, 3K), lane-aligned
            act = jnp.dot(pcat.astype(jnp.bfloat16), g_refs[l][...],
                          preferred_element_type=jnp.float32)
            act = act + b_refs[l][0, :]                        # bias added once

        out_ref[...] = act.reshape(tb, H, act.shape[1]).astype(out_ref.dtype)

    return kernel


# ---------------------------------------------------------------------------
# DecoderBlock: parameter init + forward
# ---------------------------------------------------------------------------
def init_decoder_block(key, input_dim, hidden_dim, output_dim, layers):
    """Mirrors the PyTorch DecoderBlock wiring exactly (incl. its quirk that the
    first DecoderLayer is built with in_channels=input_dim even though it
    receives hidden_dim channels; like PyTorch, this only works when
    input_dim == hidden_dim)."""
    keys = jax.random.split(key, 2 * (layers + 1))
    params = {
        "up_w": 0.1 * jax.random.normal(keys[0], (2, 2, input_dim, hidden_dim),
                                        jnp.float32),
        "up_b": 0.1 * jax.random.normal(keys[1], (hidden_dim,), jnp.float32),
        "layers": [],
    }
    if layers == 1:
        dims = [(input_dim, output_dim)]
    else:
        dims = []
        for i in range(layers):
            if i == 0:
                dims.append((input_dim, hidden_dim))
            elif i == layers - 1:
                dims.append((hidden_dim, output_dim))
            else:
                dims.append((hidden_dim, hidden_dim))
    for i, (cin, cout) in enumerate(dims):
        w = 0.1 * jax.random.normal(keys[2 + 2 * i], (3, 3, cin, cout),
                                    jnp.float32)
        b = 0.1 * jax.random.normal(keys[3 + 2 * i], (cout,), jnp.float32)
        params["layers"].append((w, b))
    return params


def _vmem_capacity_bytes():
    try:
        info = pltpu.get_tpu_info()
        cap = getattr(info, "vmem_capacity_bytes", None)
        if cap:
            return int(cap)
    except Exception:
        pass
    return 64 * 1024 * 1024        # conservative fallback (v7x per-core VMEM)


def _pick_batch_tile(B, H):
    """Pick TB so M = TB*H is >= ~256 when the batch allows, while keeping at
    least 2 'parallel' grid steps (v7x has 2 TensorCores; v5e/v6e have 1)."""
    tb = max(1, min(B, max(1, 256 // max(H, 1))))
    if pl.cdiv(B, tb) < 2 and B >= 2:
        tb = pl.cdiv(B, 2)
    return tb


def decoder_block_forward(params, x_nchw):
    B, Cin, H, W = x_nchw.shape
    Chid = params["up_w"].shape[-1]
    H2, W2 = 2 * H, 2 * W
    L = len(params["layers"])

    cin0 = params["layers"][0][0].shape[2]
    if cin0 != Chid:
        # Mirrors the PyTorch module's runtime failure when input_dim != hidden_dim.
        raise ValueError(
            "first DecoderLayer expects %d channels but upsample produces %d"
            % (cin0, Chid))

    # NCHW -> per-image rows of flattened (W, Cin) pixels (lane-dense rows).
    x_rows = jnp.transpose(x_nchw, (0, 2, 3, 1)).reshape(B, H, W * Cin)

    # Batch tiling: TB images per grid step, padded up to a whole number of steps.
    tb = _pick_batch_tile(B, H)
    nsteps = pl.cdiv(B, tb)
    Bp = nsteps * tb
    if Bp != B:
        x_rows = jnp.pad(x_rows, ((0, Bp - B), (0, 0), (0, 0)))

    # Fold the tiny deconv / conv kernels into dense banded matmul weights.
    # Weights are stored in bf16 (MXU-native, half the HBM/VMEM bytes).
    u_mat = _upsample_matrix(params["up_w"], W).astype(jnp.bfloat16)
    u_bias = jnp.tile(params["up_b"], 2 * W2).reshape(1, 2 * W2 * Chid)

    chans, g_mats, c_biases = [], [], []
    for (w3, b) in params["layers"]:
        cin_l, cout_l = int(w3.shape[2]), int(w3.shape[3])
        chans.append((cin_l, cout_l))
        g = _conv_pair_matrices(w3, W2)                        # (3, 2*W2*cin, 2*W2*cout)
        # Merge the 3 vertical taps along K so the kernel does ONE matmul/layer.
        g_mats.append(g.reshape(3 * 2 * W2 * cin_l, 2 * W2 * cout_l)
                      .astype(jnp.bfloat16))
        c_biases.append(jnp.tile(b, 2 * W2).reshape(1, 2 * W2 * cout_l))
    cout_last = chans[-1][1]
    n_last = 2 * W2 * cout_last

    kernel = _make_fused_kernel(L, tb, H, W2, chans)

    in_specs = [
        pl.BlockSpec((tb, H, W * Cin), lambda i: (i, 0, 0)),
        pl.BlockSpec(u_mat.shape, lambda i: (0, 0)),
        pl.BlockSpec(u_bias.shape, lambda i: (0, 0)),
    ]
    operands = [x_rows, u_mat, u_bias]
    for g, cb in zip(g_mats, c_biases):
        in_specs.append(pl.BlockSpec(g.shape, lambda i: (0, 0)))
        in_specs.append(pl.BlockSpec(cb.shape, lambda i: (0, 0)))
        operands += [g, cb]

    # VMEM budget derived from actual buffer sizes (double-buffered blocks +
    # in-kernel temporaries + margin), capped at 75% of physical VMEM
    # (~48 MiB on v7x's 64 MiB; leaves ample headroom on v5e/v6e's 128 MiB).
    F32, BF16 = 4, 2
    block_bytes = (tb * H * W * Cin * F32 + tb * H * n_last * F32
                   + u_mat.size * BF16 + u_bias.size * F32
                   + sum(g.size * BF16 for g in g_mats)
                   + sum(cb.size * F32 for cb in c_biases))
    max_lane = max([2 * W2 * Chid]
                   + [3 * 2 * W2 * ci for ci, _ in chans]
                   + [2 * W2 * co for _, co in chans])
    temp_bytes = 6 * tb * H * max_lane * F32
    cap = _vmem_capacity_bytes()
    vmem_limit = int(min(max(2 * block_bytes + temp_bytes + (4 << 20), 16 << 20),
                         int(0.75 * cap)))

    out_pairs = pl.pallas_call(
        kernel,
        out_shape=jax.ShapeDtypeStruct((Bp, H, n_last), jnp.float32),
        grid=(nsteps,),
        in_specs=in_specs,
        out_specs=pl.BlockSpec((tb, H, n_last), lambda i: (i, 0, 0)),
        compiler_params=pltpu.CompilerParams(
            dimension_semantics=("parallel",),
            vmem_limit_bytes=vmem_limit),
    )(*operands)

    # pair-row layout -> NHWC (pure reshape, no data shuffle) -> NCHW.
    # (Kept for PyTorch-identical output; drop if the consumer takes NHWC.)
    out = out_pairs[:B].reshape(B, H2, W2, cout_last)
    return jnp.transpose(out, (0, 3, 1, 2))


# ---------------------------------------------------------------------------
# Pure-JAX reference (for a correctness spot check)
# ---------------------------------------------------------------------------
def _ref_forward(params, x_nchw):
    hi = lax.Precision.HIGHEST
    x = jnp.transpose(x_nchw, (0, 2, 3, 1))
    # ConvTranspose2d k=2 s=2
    o = jnp.einsum("bijc,xycd->bixjyd", x, params["up_w"], precision=hi)
    B, H, _, W, _, C = o.shape
    x = o.reshape(B, 2 * H, 2 * W, C) + params["up_b"]
    # ReLU + 3x3 conv layers
    for (w, b) in params["layers"]:
        xr = jnp.maximum(x, 0.0)
        xp = jnp.pad(xr, ((0, 0), (1, 1), (1, 1), (0, 0)))
        Bq, Hq, Wq, _ = x.shape
        out = jnp.zeros((Bq, Hq, Wq, w.shape[-1]), jnp.float32)
        for ky in range(3):
            for kx in range(3):
                out = out + jnp.einsum("bhwc,cd->bhwd",
                                       xp[:, ky:ky + Hq, kx:kx + Wq, :],
                                       w[ky, kx], precision=hi)
        x = out + b
    return jnp.transpose(x, (0, 3, 1, 2))


if __name__ == "__main__":
    # DecoderBlock(input_dim=4, hidden_dim=4, output_dim=8, layers=2, enable_bn=False)
    B, Cin, Chid, Cout, H, W, LAYERS = 4, 4, 4, 8, 16, 16, 2

    key = jax.random.PRNGKey(0)
    k_param, k_x = jax.random.split(key)
    params = init_decoder_block(k_param, Cin, Chid, Cout, LAYERS)
    x = jax.random.normal(k_x, (B, Cin, H, W), jnp.float32)   # NCHW like PyTorch

    out = jax.jit(decoder_block_forward)(params, x)
    out = jax.block_until_ready(out)

    assert out.shape == (B, Cout, 2 * H, 2 * W), out.shape

    ref = _ref_forward(params, x)
    err = float(jnp.max(jnp.abs(out - ref)))
    # bf16 MXU operands -> looser tolerance than the pure-f32 version; a real
    # layout/shift bug would produce O(0.1..1) errors, far above this bound.
    assert err < 3e-2, err

    print("KERNEL_OK")
</pallas_src>

<mosaic_0001>
module attributes {stable_mosaic.version = 11 : i64} {
  func.func @kernel(%arg0: i32, %arg1: memref<2x16x64xf32, #tpu.memory_space<vmem>>, %arg2: memref<64x256xbf16, #tpu.memory_space<vmem>>, %arg3: memref<1x256xf32, #tpu.memory_space<vmem>>, %arg4: memref<768x256xbf16, #tpu.memory_space<vmem>>, %arg5: memref<1x256xf32, #tpu.memory_space<vmem>>, %arg6: memref<768x512xbf16, #tpu.memory_space<vmem>>, %arg7: memref<1x512xf32, #tpu.memory_space<vmem>>, %arg8: memref<2x16x512xf32, #tpu.memory_space<vmem>>) attributes {dimension_semantics = [#tpu.dimension_semantics<parallel>], iteration_bounds = array<i64: 2>, scalar_prefetch = 0 : i64, scratch_operands = 0 : i64, tpu.core_type = #tpu.core_type<tc>, window_params = [{transform_indices = @transform_0, window_bounds = array<i64: 2, 16, 64>}, {pipeline_mode = #tpu.pipeline_mode<synchronous>, transform_indices = @transform_1, window_bounds = array<i64: 64, 256>}, {pipeline_mode = #tpu.pipeline_mode<synchronous>, transform_indices = @transform_2, window_bounds = array<i64: 1, 256>}, {pipeline_mode = #tpu.pipeline_mode<synchronous>, transform_indices = @transform_3, window_bounds = array<i64: 768, 256>}, {pipeline_mode = #tpu.pipeline_mode<synchronous>, transform_indices = @transform_4, window_bounds = array<i64: 1, 256>}, {pipeline_mode = #tpu.pipeline_mode<synchronous>, transform_indices = @transform_5, window_bounds = array<i64: 768, 512>}, {pipeline_mode = #tpu.pipeline_mode<synchronous>, transform_indices = @transform_6, window_bounds = array<i64: 1, 512>}, {transform_indices = @transform_7, window_bounds = array<i64: 2, 16, 512>}]} {
    %c0 = arith.constant 0 : index
    %c0_0 = arith.constant 0 : index
    %c0_1 = arith.constant 0 : index
    %0 = vector.load %arg1[%c0, %c0_0, %c0_1] : memref<2x16x64xf32, #tpu.memory_space<vmem>>, vector<2x16x64xf32>
    %1 = vector.shape_cast %0 : vector<2x16x64xf32> to vector<32x64xf32>
    %2 = arith.truncf %1 : vector<32x64xf32> to vector<32x64xbf16>
    %c0_2 = arith.constant 0 : index
    %c0_3 = arith.constant 0 : index
    %3 = vector.load %arg2[%c0_2, %c0_3] : memref<64x256xbf16, #tpu.memory_space<vmem>>, vector<64x256xbf16>
    %cst = arith.constant dense<0.000000e+00> : vector<32x256xf32>
    %4 = tpu.matmul %2, %3, %cst {dimension_numbers = #tpu.dot_dimension_numbers<[1], [0], [0], [1], [0, 0, 1, 1], [], []>} : vector<32x64xbf16>, vector<64x256xbf16>, vector<32x256xf32> -> vector<32x256xf32>
    %c0_4 = arith.constant 0 : index
    %c0_5 = arith.constant 0 : index
    %5 = vector.load %arg3[%c0_4, %c0_5] : memref<1x256xf32, #tpu.memory_space<vmem>>, vector<1x256xf32>
    %6 = vector.shape_cast %5 : vector<1x256xf32> to vector<256xf32>
    %7 = vector.shape_cast %6 : vector<256xf32> to vector<1x256xf32>
    %8 = vector.broadcast %7 : vector<1x256xf32> to vector<32x256xf32>
    %9 = arith.addf %4, %8 : vector<32x256xf32>
    %10 = tpu.iota {dimensions = array<i32: 0>} : vector<32x1xi32>
    %c16_i32 = arith.constant 16 : i32
    %c0_i32 = arith.constant 0 : i32
    %11 = arith.cmpi eq, %c16_i32, %c0_i32 : i32
    %c1_i32 = arith.constant 1 : i32
    %12 = arith.select %11, %c1_i32, %c16_i32 : i32
    %13 = vector.broadcast %12 : i32 to vector<32x1xi32>
    %14 = arith.remsi %10, %13 : vector<32x1xi32>
    %c0_i32_6 = arith.constant 0 : i32
    %15 = vector.broadcast %c0_i32_6 : i32 to vector<32x1xi32>
    %16 = arith.cmpi ne, %14, %15 : vector<32x1xi32>
    %c0_i32_7 = arith.constant 0 : i32
    %17 = vector.broadcast %c0_i32_7 : i32 to vector<32x1xi32>
    %18 = arith.cmpi slt, %14, %17 : vector<32x1xi32>
    %c0_i32_8 = arith.constant 0 : i32
    %19 = arith.cmpi slt, %12, %c0_i32_8 : i32
    %20 = vector.broadcast %19 : i1 to vector<32x1xi1>
    %21 = vector.broadcast %20 : vector<32x1xi1> to vector<32x1xi1>
    %22 = arith.xori %18, %21 : vector<32x1xi1>
    %23 = arith.andi %22, %16 : vector<32x1xi1>
    %24 = vector.broadcast %12 : i32 to vector<32x1xi32>
    %25 = arith.addi %14, %24 : vector<32x1xi32>
    %26 = arith.select %23, %25, %14 : vector<32x1xi1>, vector<32x1xi32>
    %c0_i32_9 = arith.constant 0 : i32
    %27 = vector.broadcast %c0_i32_9 : i32 to vector<32x1xi32>
    %28 = arith.cmpi ne, %26, %27 : vector<32x1xi32>
    %c16_i32_10 = arith.constant 16 : i32
    %c0_i32_11 = arith.constant 0 : i32
    %29 = arith.cmpi eq, %c16_i32_10, %c0_i32_11 : i32
    %c1_i32_12 = arith.constant 1 : i32
    %30 = arith.select %29, %c1_i32_12, %c16_i32_10 : i32
    %31 = vector.broadcast %30 : i32 to vector<32x1xi32>
    %32 = arith.remsi %10, %31 : vector<32x1xi32>
    %c0_i32_13 = arith.constant 0 : i32
    %33 = vector.broadcast %c0_i32_13 : i32 to vector<32x1xi32>
    %34 = arith.cmpi ne, %32, %33 : vector<32x1xi32>
    %c0_i32_14 = arith.constant 0 : i32
    %35 = vector.broadcast %c0_i32_14 : i32 to vector<32x1xi32>
    %36 = arith.cmpi slt, %32, %35 : vector<32x1xi32>
    %c0_i32_15 = arith.constant 0 : i32
    %37 = arith.cmpi slt, %30, %c0_i32_15 : i32
    %38 = vector.broadcast %37 : i1 to vector<32x1xi1>
    %39 = vector.broadcast %38 : vector<32x1xi1> to vector<32x1xi1>
    %40 = arith.xori %36, %39 : vector<32x1xi1>
    %41 = arith.andi %40, %34 : vector<32x1xi1>
    %42 = vector.broadcast %30 : i32 to vector<32x1xi32>
    %43 = arith.addi %32, %42 : vector<32x1xi32>
    %44 = arith.select %41, %43, %32 : vector<32x1xi1>, vector<32x1xi32>
    %c15_i32 = arith.constant 15 : i32
    %45 = vector.broadcast %c15_i32 : i32 to vector<32x1xi32>
    %46 = arith.cmpi ne, %44, %45 : vector<32x1xi32>
    %cst_16 = arith.constant 0.000000e+00 : f32
    %47 = vector.broadcast %cst_16 : f32 to vector<32x256xf32>
    %48 = arith.maximumf %9, %47 : vector<32x256xf32>
    %cst_17 = arith.constant 0.000000e+00 : f32
    %49 = vector.broadcast %cst_17 : f32 to vector<1x256xf32>
    %50 = vector.extract_strided_slice %48 {offsets = [0, 0], sizes = [31, 256], strides = [1, 1]} : vector<32x256xf32> to vector<31x256xf32>
    %51 = tpu.concatenate %49, %50 in 0 : vector<1x256xf32>, vector<31x256xf32> -> vector<32x256xf32>
    %cst_18 = arith.constant 0.000000e+00 : f32
    %52 = vector.shape_cast %28 : vector<32x1xi1> to vector<32x1xi1>
    %53 = vector.broadcast %52 : vector<32x1xi1> to vector<32x256xi1>
    %54 = vector.broadcast %cst_18 : f32 to vector<32x256xf32>
    %55 = arith.select %53, %51, %54 : vector<32x256xi1>, vector<32x256xf32>
    %56 = vector.extract_strided_slice %48 {offsets = [1, 0], sizes = [31, 256], strides = [1, 1]} : vector<32x256xf32> to vector<31x256xf32>
    %57 = tpu.concatenate %56, %49 in 0 : vector<31x256xf32>, vector<1x256xf32> -> vector<32x256xf32>
    %cst_19 = arith.constant 0.000000e+00 : f32
    %58 = vector.shape_cast %46 : vector<32x1xi1> to vector<32x1xi1>
    %59 = vector.broadcast %58 : vector<32x1xi1> to vector<32x256xi1>
    %60 = vector.broadcast %cst_19 : f32 to vector<32x256xf32>
    %61 = arith.select %59, %57, %60 : vector<32x256xi1>, vector<32x256xf32>
    %62 = tpu.concatenate %55, %48, %61 in 1 : vector<32x256xf32>, vector<32x256xf32>, vector<32x256xf32> -> vector<32x768xf32>
    %63 = arith.truncf %62 : vector<32x768xf32> to vector<32x768xbf16>
    %c0_20 = arith.constant 0 : index
    %c0_21 = arith.constant 0 : index
    %64 = vector.load %arg4[%c0_20, %c0_21] : memref<768x256xbf16, #tpu.memory_space<vmem>>, vector<768x256xbf16>
    %cst_22 = arith.constant dense<0.000000e+00> : vector<32x256xf32>
    %65 = tpu.matmul %63, %64, %cst_22 {dimension_numbers = #tpu.dot_dimension_numbers<[1], [0], [0], [1], [0, 0, 1, 1], [], []>} : vector<32x768xbf16>, vector<768x256xbf16>, vector<32x256xf32> -> vector<32x256xf32>
    %c0_23 = arith.constant 0 : index
    %c0_24 = arith.constant 0 : index
    %66 = vector.load %arg5[%c0_23, %c0_24] : memref<1x256xf32, #tpu.memory_space<vmem>>, vector<1x256xf32>
    %67 = vector.shape_cast %66 : vector<1x256xf32> to vector<256xf32>
    %68 = vector.shape_cast %67 : vector<256xf32> to vector<1x256xf32>
    %69 = vector.broadcast %68 : vector<1x256xf32> to vector<32x256xf32>
    %70 = arith.addf %65, %69 : vector<32x256xf32>
    %cst_25 = arith.constant 0.000000e+00 : f32
    %71 = vector.broadcast %cst_25 : f32 to vector<32x256xf32>
    %72 = arith.maximumf %70, %71 : vector<32x256xf32>
    %cst_26 = arith.constant 0.000000e+00 : f32
    %73 = vector.broadcast %cst_26 : f32 to vector<1x256xf32>
    %74 = vector.extract_strided_slice %72 {offsets = [0, 0], sizes = [31, 256], strides = [1, 1]} : vector<32x256xf32> to vector<31x256xf32>
    %75 = tpu.concatenate %73, %74 in 0 : vector<1x256xf32>, vector<31x256xf32> -> vector<32x256xf32>
    %cst_27 = arith.constant 0.000000e+00 : f32
    %76 = vector.shape_cast %28 : vector<32x1xi1> to vector<32x1xi1>
    %77 = vector.broadcast %76 : vector<32x1xi1> to vector<32x256xi1>
    %78 = vector.broadcast %cst_27 : f32 to vector<32x256xf32>
    %79 = arith.select %77, %75, %78 : vector<32x256xi1>, vector<32x256xf32>
    %80 = vector.extract_strided_slice %72 {offsets = [1, 0], sizes = [31, 256], strides = [1, 1]} : vector<32x256xf32> to vector<31x256xf32>
    %81 = tpu.concatenate %80, %73 in 0 : vector<31x256xf32>, vector<1x256xf32> -> vector<32x256xf32>
    %cst_28 = arith.constant 0.000000e+00 : f32
    %82 = vector.shape_cast %46 : vector<32x1xi1> to vector<32x1xi1>
    %83 = vector.broadcast %82 : vector<32x1xi1> to vector<32x256xi1>
    %84 = vector.broadcast %cst_28 : f32 to vector<32x256xf32>
    %85 = arith.select %83, %81, %84 : vector<32x256xi1>, vector<32x256xf32>
    %86 = tpu.concatenate %79, %72, %85 in 1 : vector<32x256xf32>, vector<32x256xf32>, vector<32x256xf32> -> vector<32x768xf32>
    %87 = arith.truncf %86 : vector<32x768xf32> to vector<32x768xbf16>
    %c0_29 = arith.constant 0 : index
    %c0_30 = arith.constant 0 : index
    %88 = vector.load %arg6[%c0_29, %c0_30] : memref<768x512xbf16, #tpu.memory_space<vmem>>, vector<768x512xbf16>
    %cst_31 = arith.constant dense<0.000000e+00> : vector<32x512xf32>
    %89 = tpu.matmul %87, %88, %cst_31 {dimension_numbers = #tpu.dot_dimension_numbers<[1], [0], [0], [1], [0, 0, 1, 1], [], []>} : vector<32x768xbf16>, vector<768x512xbf16>, vector<32x512xf32> -> vector<32x512xf32>
    %c0_32 = arith.constant 0 : index
    %c0_33 = arith.constant 0 : index
    %90 = vector.load %arg7[%c0_32, %c0_33] : memref<1x512xf32, #tpu.memory_space<vmem>>, vector<1x512xf32>
    %91 = vector.shape_cast %90 : vector<1x512xf32> to vector<512xf32>
    %92 = vector.shape_cast %91 : vector<512xf32> to vector<1x512xf32>
    %93 = vector.broadcast %92 : vector<1x512xf32> to vector<32x512xf32>
    %94 = arith.addf %89, %93 : vector<32x512xf32>
    %95 = vector.shape_cast %94 : vector<32x512xf32> to vector<2x16x512xf32>
    %c0_34 = arith.constant 0 : index
    %c0_35 = arith.constant 0 : index
    %c0_36 = arith.constant 0 : index
    %96 = vector.load %arg8[%c0_34, %c0_35, %c0_36] : memref<2x16x512xf32, #tpu.memory_space<vmem>>, vector<2x16x512xf32>
    tpu.vector_store %arg8[%c0_34, %c0_35, %c0_36], %95 {strides = array<i32>} : memref<2x16x512xf32, #tpu.memory_space<vmem>>, vector<2x16x512xf32>,
    return
  }
  func.func @transform_0(%arg0: i32) -> (i32, i32, i32) {
    %c0_i32 = arith.constant 0 : i32
    %c0_i32_0 = arith.constant 0 : i32
    %c0_i32_1 = arith.constant 0 : i32
    return %arg0, %c0_i32, %c0_i32_0 : i32, i32, i32
  }
  func.func @transform_1(%arg0: i32) -> (i32, i32) {
    %c0_i32 = arith.constant 0 : i32
    %c0_i32_0 = arith.constant 0 : i32
    %c0_i32_1 = arith.constant 0 : i32
    return %c0_i32, %c0_i32_0 : i32, i32
  }
  func.func @transform_2(%arg0: i32) -> (i32, i32) {
    %c0_i32 = arith.constant 0 : i32
    %c0_i32_0 = arith.constant 0 : i32
    %c0_i32_1 = arith.constant 0 : i32
    return %c0_i32, %c0_i32_0 : i32, i32
  }
  func.func @transform_3(%arg0: i32) -> (i32, i32) {
    %c0_i32 = arith.constant 0 : i32
    %c0_i32_0 = arith.constant 0 : i32
    %c0_i32_1 = arith.constant 0 : i32
    return %c0_i32, %c0_i32_0 : i32, i32
  }
  func.func @transform_4(%arg0: i32) -> (i32, i32) {
    %c0_i32 = arith.constant 0 : i32
    %c0_i32_0 = arith.constant 0 : i32
    %c0_i32_1 = arith.constant 0 : i32
    return %c0_i32, %c0_i32_0 : i32, i32
  }
  func.func @transform_5(%arg0: i32) -> (i32, i32) {
    %c0_i32 = arith.constant 0 : i32
    %c0_i32_0 = arith.constant 0 : i32
    %c0_i32_1 = arith.constant 0 : i32
    return %c0_i32, %c0_i32_0 : i32, i32
  }
  func.func @transform_6(%arg0: i32) -> (i32, i32) {
    %c0_i32 = arith.constant 0 : i32
    %c0_i32_0 = arith.constant 0 : i32
    %c0_i32_1 = arith.constant 0 : i32
    return %c0_i32, %c0_i32_0 : i32, i32
  }
  func.func @transform_7(%arg0: i32) -> (i32, i32, i32) {
    %c0_i32 = arith.constant 0 : i32
    %c0_i32_0 = arith.constant 0 : i32
    %c0_i32_1 = arith.constant 0 : i32
    return %arg0, %c0_i32, %c0_i32_0 : i32, i32, i32
  }
}

</mosaic_0001>

<bundles_post_ra>
// kernel: tile.28
= control target key start
LH: loop header
LB: loop body
LE: loop exit
PB: predicated region body
PF: predicated region fallthrough
CT: control target
= control target key end

     0   :  { %s64_s0 = inlined_call_operand.vmem [shape: f32[8], index: 0, kind: input, shape index: {}]   ;;  %s65_s1 = inlined_call_operand.vmem [shape: f32[64,8], index: 1, kind: output, shape index: {}]  }
   0x1   :  { %v4_v0 = vld [vmem:[%s64_s0] ss:$0 sm:$0xff] }
   0x2   :  { %5 = vst [vmem:[%s65_s1] sm:$0xff] %v4_v0  ;;  %20 = vst [vmem:[%s65_s1 + $0x8] sm:$0xff] %v4_v0 }
   0x3   :  { %21 = vst [vmem:[%s65_s1 + $0x10] sm:$0xff] %v4_v0  ;;  %22 = vst [vmem:[%s65_s1 + $0x18] sm:$0xff] %v4_v0 }
   0x4   :  { %23 = vst [vmem:[%s65_s1 + $0x20] sm:$0xff] %v4_v0  ;;  %24 = vst [vmem:[%s65_s1 + $0x28] sm:$0xff] %v4_v0 }
   0x5   :  { %25 = vst [vmem:[%s65_s1 + $0x30] sm:$0xff] %v4_v0  ;;  %26 = vst [vmem:[%s65_s1 + $0x38] sm:$0xff] %v4_v0 }

// kernel: tile.29
= control target key start
LH: loop header
LB: loop body
LE: loop exit
PB: predicated region body
PF: predicated region fallthrough
CT: control target
= control target key end

     0   :  { %vm6_vm0 = vcmask 1043458   ;;  %s11_s6 = smov 3  ;;  %s14_s7 = smov 12  ;;  %vm8_vm1 = vcmask 64512   ;;  %vm20_vm2 = vcmask 1048512   ;;  %vm32_vm3 = vcmask 982912   ;;  %s412_s0 = inlined_call_operand.vmem [shape: f32[64,8], index: 0, kind: input, shape index: {}]   ;;  %s413_s1 = inlined_call_operand.vmem [shape: f32[1,512], index: 1, kind: output, shape index: {}]  }
   0x1   :  { %v215_v0 = vld [vmem:[%s412_s0 + $0xf] ss:$16 sm:%s11_s6]   ;;  %s35_s12 = smov 3  ;;  %s38_s15 = smov 12  ;;  %vm44_vm4 = vcmask 917312   ;;  %vm56_vm5 = vcmask 851712  }
   0x2   :  { %v216_v1 = vld [vmem:[%s412_s0 + $0xf] ss:$16 sm:%s14_s7]   ;;  %v219_v3 = vld [vmem:[%s412_s0 + $0xd] ss:$16 sm:%s35_s12]   ;;  %s263_s16 = smov 120   ;;  %s23_s19 = smov 3 }
   0x3   :  { %v17_v2 = vsel %vm6_vm0, %v216_v1, %v215_v0  ;;  %v220_v4 = vld [vmem:[%s412_s0 + $0xd] ss:$16 sm:%s38_s15]   ;;  %s26_s20 = smov 12  ;;  %v217_v6 = vld [vmem:[%s412_s0 + $0xe] ss:$16 sm:%s23_s19]   ;;  %s47_s25 = smov 3 }
   0x4   :  { %18 = vrot.lane.b32.xlu0 %v17_v2, %s263_s16  ;;  %v41_v5 = vsel %vm6_vm0, %v220_v4, %v219_v3  ;;  %v218_v7 = vld [vmem:[%s412_s0 + $0xe] ss:$16 sm:%s26_s20]   ;;  %s264_s26 = smov 104   ;;  %s50_s29 = smov 12  ;;  %vm68_vm6 = vcmask 786112   ;;  %vm80_vm7 = vcmask 720512  }
   0x5   :  { %42 = vrot.lane.b32.xlu1 %v41_v5, %s264_s26  ;;  %v29_v8 = vsel %vm6_vm0, %v218_v7, %v217_v6  ;;  %v221_v9 = vld [vmem:[%s412_s0 + $0xc] ss:$16 sm:%s47_s25]   ;;  %s59_s3 = smov 3  ;;  %s62_s4 = smov 12  ;;  %vm92_vm8 = vcmask 654912   ;;  %vm104_vm9 = vcmask 589312  }
   0x6   :  { %v222_v10 = vld [vmem:[%s412_s0 + $0xc] ss:$16 sm:%s50_s29]   ;;  %s265_s5 = smov 112   ;;  %v223_v12 = vld [vmem:[%s412_s0 + $0xb] ss:$16 sm:%s59_s3]   ;;  %s71_s8 = smov 3 }
   0x7   :  { %v53_v11 = vsel %vm6_vm0, %v222_v10, %v221_v9  ;;  %v224_v13 = vld [vmem:[%s412_s0 + $0xb] ss:$16 sm:%s62_s4]   ;;  %v225_v14 = vld [vmem:[%s412_s0 + $0xa] ss:$16 sm:%s71_s8]   ;;  %s74_s13 = smov 12  ;;  %s266_s14 = smov 96  }
   0x8   :  { %30 = vrot.lane.b32.xlu0 %v29_v8, %s265_s5  ;;  %v65_v15 = vsel %vm6_vm0, %v224_v13, %v223_v12  ;;  %v226_v16 = vld [vmem:[%s412_s0 + $0xa] ss:$16 sm:%s74_s13]   ;;  %s83_s17 = smov 3  ;;  %s86_s18 = smov 12  ;;  %vm116_vm10 = vcmask 523712   ;;  %vm128_vm11 = vcmask 458112  }
   0x9   :  { %54 = vrot.lane.b32.xlu1 %v53_v11, %s266_s14  ;;  %v77_v17 = vsel %vm6_vm0, %v226_v16, %v225_v14  ;;  %v227_v18 = vld [vmem:[%s412_s0 + $0x9] ss:$16 sm:%s83_s17]   ;;  %s95_s23 = smov 3  ;;  %s267_s24 = smov 88   ;;  %vm140_vm12 = vcmask 392512   ;;  %vm152_vm13 = vcmask 326912  }
   0xa   :  { %v228_v19 = vld [vmem:[%s412_s0 + $0x9] ss:$16 sm:%s86_s18]   ;;  %v229_v20 = vld [vmem:[%s412_s0 + $0x8] ss:$16 sm:%s95_s23]   ;;  %s98_s27 = smov 12  ;;  %s107_s30 = smov 3 }
   0xb   :  { %v89_v21 = vsel %vm6_vm0, %v228_v19, %v227_v18  ;;  %v230_v22 = vld [vmem:[%s412_s0 + $0x8] ss:$16 sm:%s98_s27]   ;;  %s110_s2 = smov 12  ;;  %s268_s3 = smov 80   ;;  %v231_v23 = vld [vmem:[%s412_s0 + $0x7] ss:$16 sm:%s107_s30]  }
   0xc   :  { %66 = vrot.lane.b32.xlu0 %v65_v15, %s267_s24  ;;  %s119_s6 = smov 3  ;;  %v101_v24 = vsel %vm6_vm0, %v230_v22, %v229_v20  ;;  %v232_v25 = vld [vmem:[%s412_s0 + $0x7] ss:$16 sm:%s110_s2]   ;;  %s122_s11 = smov 12  ;;  %vm164_vm14 = vcmask 261312   ;;  %vm176_vm15 = vcmask 195712  }
   0xd   :  { %78 = vrot.lane.b32.xlu1 %v77_v17, %s268_s3  ;;  %v233_v26 = vld [vmem:[%s412_s0 + $0x6] ss:$16 sm:%s119_s6]   ;;  %s269_s12 = smov 72   ;;  %s131_s15 = smov 3  ;;  %v113_v28 = vsel %vm6_vm0, %v232_v25, %v231_v23 }
   0xe   :  { %v234_v27 = vld [vmem:[%s412_s0 + $0x6] ss:$16 sm:%s122_s11]   ;;  %s134_s16 = smov 12  ;;  %v235_v29 = vld [vmem:[%s412_s0 + $0x5] ss:$16 sm:%s131_s15]   ;;  %s143_s19 = smov 3 }
   0xf   :  { %s270_s20 = smov 64   ;;  %v236_v30 = vld [vmem:[%s412_s0 + $0x5] ss:$16 sm:%s134_s16]   ;;  %s146_s23 = smov 12  ;;  %v125_v31 = vsel %vm6_vm0, %v234_v27, %v233_v26  ;;  %v237_v32 = vld [vmem:[%s412_s0 + $0x4] ss:$16 sm:%s143_s19]  }
  0x10   :  { %90 = vrot.lane.b32.xlu0 %v89_v21, %s269_s12  ;;  %s155_s26 = smov 3  ;;  %s158_s27 = smov 12  ;;  %v238_v33 = vld [vmem:[%s412_s0 + $0x4] ss:$16 sm:%s146_s23]   ;;  %v137_v34 = vsel %vm6_vm0, %v236_v30, %v235_v29 }
  0x11   :  { %102 = vrot.lane.b32.xlu1 %v101_v24, %s270_s20  ;;  %s271_s28 = smov 56   ;;  %s167_s2 = smov 3  ;;  %v239_v35 = vld [vmem:[%s412_s0 + $0x3] ss:$16 sm:%s155_s26]   ;;  %v149_v37 = vsel %vm6_vm0, %v238_v33, %v237_v32 }
  0x12   :  { %s170_s5 = smov 12  ;;  %s272_s6 = smov 48   ;;  %v240_v36 = vld [vmem:[%s412_s0 + $0x3] ss:$16 sm:%s158_s27]   ;;  %v241_v38 = vld [vmem:[%s412_s0 + $0x2] ss:$16 sm:%s167_s2]  }
  0x13   :  { %s179_s9 = smov 3  ;;  %v242_v39 = vld [vmem:[%s412_s0 + $0x2] ss:$16 sm:%s170_s5]   ;;  %s182_s14 = smov 12  ;;  %v161_v41 = vsel %vm6_vm0, %v240_v36, %v239_v35 }
  0x14   :  { %114 = vrot.lane.b32.xlu0 %v113_v28, %s271_s28  ;;  %s2_s15 = smov 3  ;;  %s273_s16 = smov 40   ;;  %v243_v42 = vld [vmem:[%s412_s0 + $0x1] ss:$16 sm:%s179_s9]   ;;  %v173_v46 = vsel %vm6_vm0, %v242_v39, %v241_v38 }
  0x15   :  { %126 = vrot.lane.b32.xlu1 %v125_v31, %s272_s6  ;;  %v3_v40 = vld [vmem:[%s412_s0] ss:$16 sm:%s2_s15]   ;;  %s4_s19 = smov 12  ;;  %s274_s24 = smov 32  }
  0x16   :  { %v5_v43 = vld [vmem:[%s412_s0] ss:$16 sm:%s4_s19]   ;;  %v244_v44 = vld [vmem:[%s412_s0 + $0x1] ss:$16 sm:%s182_s14]   ;;  %s275_s0 = smov 24   ;;  %s276_s27 = smov 16  }
  0x17   :  { %v7_v45 = vsel %vm6_vm0, %v5_v43, %v3_v40  ;;  %v185_v47 = vsel %vm6_vm0, %v244_v44, %v243_v42  ;;  %s277_s28 = smov 8   ;;  %vm188_vm0 = vcmask 130112  }
  0x18   :  { %138 = vrot.lane.b32.xlu0 %v137_v34, %s273_s16  ;;  %9 = vst.msk [vmem:[#allocation0] ss:$8 sm:$0xf] %vm8_vm1, %v7_v45  }
  0x19   :  { %150 = vrot.lane.b32.xlu1 %v149_v37, %s274_s24 }
  0x1c   :  { %162 = vrot.lane.b32.xlu0 %v161_v41, %s275_s0 }
  0x1d   :  { %174 = vrot.lane.b32.xlu1 %v173_v46, %s276_s27 }
  0x20   :  { %186 = vrot.lane.b32.xlu0 %v185_v47, %s277_s28 }
  0x76   :  { %v19_v48 = vpop.permute.xlu0 %18  }
  0x77   :  { %21 = vst.msk [vmem:[#allocation0] ss:$8 sm:$0xf] %vm20_vm2, %v19_v48   ;;  %v43_v49 = vpop.permute.xlu1 %42  }
  0x7a   :  { %v31_v50 = vpop.permute.xlu0 %30  }
  0x7b   :  { %33 = vst.msk [vmem:[#allocation0] ss:$8 sm:$0xf] %vm32_vm3, %v31_v50   ;;  %v55_v51 = vpop.permute.xlu1 %54  }
  0x7c   :  { %45 = vst.msk [vmem:[#allocation0] ss:$8 sm:$0xf] %vm44_vm4, %v43_v49  }
  0x7d   :  { %57 = vst.msk [vmem:[#allocation0] ss:$8 sm:$0xf] %vm56_vm5, %v55_v51  }
  0x7e   :  { %v67_v52 = vpop.permute.xlu0 %66  }
  0x7f   :  { %69 = vst.msk [vmem:[#allocation0] ss:$8 sm:$0xf] %vm68_vm6, %v67_v52   ;;  %v79_v53 = vpop.permute.xlu1 %78  }
  0x80   :  { %81 = vst.msk [vmem:[#allocation0] ss:$8 sm:$0xf] %vm80_vm7, %v79_v53  }
  0x82   :  { %v91_v54 = vpop.permute.xlu0 %90  }
  0x83   :  { %93 = vst.msk [vmem:[#allocation0] ss:$8 sm:$0xf] %vm92_vm8, %v91_v54   ;;  %v103_v55 = vpop.permute.xlu1 %102  }
  0x84   :  { %105 = vst.msk [vmem:[#allocation0] ss:$8 sm:$0xf] %vm104_vm9, %v103_v55  }
  0x86   :  { %v115_v56 = vpop.permute.xlu0 %114  }
  0x87   :  { %117 = vst.msk [vmem:[#allocation0] ss:$8 sm:$0xf] %vm116_vm10, %v115_v56   ;;  %v127_v57 = vpop.permute.xlu1 %126  }
  0x88   :  { %129 = vst.msk [vmem:[#allocation0] ss:$8 sm:$0xf] %vm128_vm11, %v127_v57  }
  0x8a   :  { %v139_v58 = vpop.permute.xlu0 %138  }
  0x8b   :  { %141 = vst.msk [vmem:[#allocation0] ss:$8 sm:$0xf] %vm140_vm12, %v139_v58   ;;  %v151_v59 = vpop.permute.xlu1 %150  }
  0x8c   :  { %153 = vst.msk [vmem:[#allocation0] ss:$8 sm:$0xf] %vm152_vm13, %v151_v59  }
  0x8e   :  { %v163_v60 = vpop.permute.xlu0 %162  }
  0x8f   :  { %165 = vst.msk [vmem:[#allocation0] ss:$8 sm:$0xf] %vm164_vm14, %v163_v60   ;;  %v175_v61 = vpop.permute.xlu1 %174  }
  0x90   :  { %177 = vst.msk [vmem:[#allocation0] ss:$8 sm:$0xf] %vm176_vm15, %v175_v61  }
  0x92   :  { %v187_v62 = vpop.permute.xlu0 %186  }
  0x93   :  { %189 = vst.msk [vmem:[#allocation0] ss:$8 sm:$0xf] %vm188_vm0, %v187_v62  }
  0x9a   :  { %v193_v63 = vld [vmem:[#allocation0] sm:$0x1]  ;;  %v197_v0 = vld [vmem:[#allocation0 + $0x8] sm:$0x1]  ;;  %v202_v1 = vld [vmem:[#allocation0 + $0x10] sm:$0x1] }
  0x9b   :  { %195 = vst [vmem:[%s413_s1] sm:$0x1] %v193_v63  ;;  %245 = vst [vmem:[%s413_s1 + $0x1] sm:$0x1] %v197_v0  ;;  %v208_v2 = vld [vmem:[#allocation0 + $0x18] sm:$0x1] }
  0x9c   :  { %246 = vst [vmem:[%s413_s1 + $0x2] sm:$0x1] %v202_v1  ;;  %247 = vst [vmem:[%s413_s1 + $0x3] sm:$0x1] %v208_v2 }

// kernel: tile.18
= control target key start
LH: loop header
LB: loop body
LE: loop exit
PB: predicated region body
PF: predicated region fallthrough
CT: control target
= control target key end

     0   :  { %s64_s0 = inlined_call_operand.vmem [shape: f32[4], index: 0, kind: input, shape index: {}]   ;;  %s65_s1 = inlined_call_operand.vmem [shape: f32[64,4], index: 1, kind: output, shape index: {}]  }
   0x1   :  { %v4_v0 = vld [vmem:[%s64_s0] ss:$0 sm:$0xff] }
   0x2   :  { %5 = vst [vmem:[%s65_s1] sm:$0xff] %v4_v0  ;;  %20 = vst [vmem:[%s65_s1 + $0x8] sm:$0xff] %v4_v0 }
   0x3   :  { %21 = vst [vmem:[%s65_s1 + $0x10] sm:$0xff] %v4_v0  ;;  %22 = vst [vmem:[%s65_s1 + $0x18] sm:$0xff] %v4_v0 }
   0x4   :  { %23 = vst [vmem:[%s65_s1 + $0x20] sm:$0xff] %v4_v0  ;;  %24 = vst [vmem:[%s65_s1 + $0x28] sm:$0xff] %v4_v0 }
   0x5   :  { %25 = vst [vmem:[%s65_s1 + $0x30] sm:$0xff] %v4_v0  ;;  %26 = vst [vmem:[%s65_s1 + $0x38] sm:$0xff] %v4_v0 }

// kernel: tile.19
= control target key start
LH: loop header
LB: loop body
LE: loop exit
PB: predicated region body
PF: predicated region fallthrough
CT: control target
= control target key end

     0   :  { %vm5_vm0 = vcmask 1041409   ;;  %s425_s14 = smov 124   ;;  %s426_s21 = smov 116   ;;  %vm7_vm1 = vcmask 31744   ;;  %vm17_vm2 = vcmask 1048544   ;;  %vm27_vm3 = vcmask 1015744   ;;  %s696_s0 = inlined_call_operand.vmem [shape: f32[64,4], index: 0, kind: input, shape index: {}]   ;;  %s697_s1 = inlined_call_operand.vmem [shape: f32[1,256], index: 1, kind: output, shape index: {}]  }
   0x1   :  { %v331_v0 = vld [vmem:[%s696_s0 + $0x1f] sm:$0x1]   ;;  %v335_v3 = vld [vmem:[%s696_s0 + $0x1d] sm:$0x1]   ;;  %v333_v6 = vld [vmem:[%s696_s0 + $0x1e] sm:$0x1]  }
   0x2   :  { %v332_v1 = vld [vmem:[%s696_s0 + $0x3e] sm:$0x2]   ;;  %v336_v4 = vld [vmem:[%s696_s0 + $0x3c] sm:$0x2]   ;;  %v334_v7 = vld [vmem:[%s696_s0 + $0x3d] sm:$0x2]  }
   0x3   :  { %v14_v2 = vsel %vm5_vm0, %v332_v1, %v331_v0  ;;  %v34_v5 = vsel %vm5_vm0, %v336_v4, %v335_v3  ;;  %v337_v8 = vld [vmem:[%s696_s0 + $0x1c] sm:$0x1]   ;;  %v24_v9 = vsel %vm5_vm0, %v334_v7, %v333_v6  ;;  %v339_v12 = vld [vmem:[%s696_s0 + $0x1b] sm:$0x1]   ;;  %v341_v14 = vld [vmem:[%s696_s0 + $0x1a] sm:$0x1]  }
   0x4   :  { %15 = vrot.lane.b32.xlu0 %v14_v2, %s425_s14  ;;  %35 = vrot.lane.b32.xlu1 %v34_v5, %s426_s21  ;;  %v338_v10 = vld [vmem:[%s696_s0 + $0x3b] sm:$0x2]   ;;  %v340_v13 = vld [vmem:[%s696_s0 + $0x3a] sm:$0x2]   ;;  %s427_s3 = smov 120   ;;  %s428_s4 = smov 112  }
   0x5   :  { %v44_v11 = vsel %vm5_vm0, %v338_v10, %v337_v8  ;;  %v342_v15 = vld [vmem:[%s696_s0 + $0x39] sm:$0x2]   ;;  %v54_v16 = vsel %vm5_vm0, %v340_v13, %v339_v12  ;;  %v343_v18 = vld [vmem:[%s696_s0 + $0x19] sm:$0x1]   ;;  %v345_v20 = vld [vmem:[%s696_s0 + $0x18] sm:$0x1]  }
   0x6   :  { %v64_v17 = vsel %vm5_vm0, %v342_v15, %v341_v14  ;;  %v344_v19 = vld [vmem:[%s696_s0 + $0x38] sm:$0x2]   ;;  %v346_v21 = vld [vmem:[%s696_s0 + $0x37] sm:$0x2]   ;;  %s429_s13 = smov 108   ;;  %s430_s14 = smov 104  }
   0x7   :  { %v74_v22 = vsel %vm5_vm0, %v344_v19, %v343_v18  ;;  %v84_v23 = vsel %vm5_vm0, %v346_v21, %v345_v20  ;;  %v347_v24 = vld [vmem:[%s696_s0 + $0x17] sm:$0x1]   ;;  %v349_v26 = vld [vmem:[%s696_s0 + $0x16] sm:$0x1]   ;;  %s431_s23 = smov 100   ;;  %s432_s24 = smov 96  }
   0x8   :  { %25 = vrot.lane.b32.xlu0 %v24_v9, %s427_s3  ;;  %45 = vrot.lane.b32.xlu1 %v44_v11, %s428_s4  ;;  %v348_v25 = vld [vmem:[%s696_s0 + $0x36] sm:$0x2]   ;;  %v350_v27 = vld [vmem:[%s696_s0 + $0x35] sm:$0x2]   ;;  %s433_s4 = smov 92   ;;  %s434_s5 = smov 88  }
   0x9   :  { %v94_v28 = vsel %vm5_vm0, %v348_v25, %v347_v24  ;;  %v104_v29 = vsel %vm5_vm0, %v350_v27, %v349_v26  ;;  %v351_v30 = vld [vmem:[%s696_s0 + $0x15] sm:$0x1]   ;;  %v353_v32 = vld [vmem:[%s696_s0 + $0x14] sm:$0x1]   ;;  %v355_v36 = vld [vmem:[%s696_s0 + $0x13] sm:$0x1]  }
   0xa   :  { %v352_v31 = vld [vmem:[%s696_s0 + $0x34] sm:$0x2]   ;;  %v354_v33 = vld [vmem:[%s696_s0 + $0x33] sm:$0x2]   ;;  %v356_v37 = vld [vmem:[%s696_s0 + $0x32] sm:$0x2]  }
   0xb   :  { %v114_v34 = vsel %vm5_vm0, %v352_v31, %v351_v30  ;;  %v124_v35 = vsel %vm5_vm0, %v354_v33, %v353_v32  ;;  %v357_v38 = vld [vmem:[%s696_s0 + $0x12] sm:$0x1]   ;;  %s436_s15 = smov 80   ;;  %v134_v40 = vsel %vm5_vm0, %v356_v37, %v355_v36  ;;  %v359_v42 = vld [vmem:[%s696_s0 + $0x11] sm:$0x1]   ;;  %s438_s29 = smov 72  }
   0xc   :  { %55 = vrot.lane.b32.xlu0 %v54_v16, %s429_s13  ;;  %65 = vrot.lane.b32.xlu1 %v64_v17, %s430_s14  ;;  %v358_v39 = vld [vmem:[%s696_s0 + $0x31] sm:$0x2]   ;;  %s435_s14 = smov 84   ;;  %v360_v43 = vld [vmem:[%s696_s0 + $0x30] sm:$0x2]   ;;  %s439_s9 = smov 68  }
   0xd   :  { %v144_v41 = vsel %vm5_vm0, %v358_v39, %v357_v38  ;;  %v361_v44 = vld [vmem:[%s696_s0 + $0x10] sm:$0x1]   ;;  %v2_v46 = vld [vmem:[%s696_s0] sm:$0x1]   ;;  %v154_v48 = vsel %vm5_vm0, %v360_v43, %v359_v42  ;;  %v363_v51 = vld [vmem:[%s696_s0 + $0xf] sm:$0x1]  }
   0xe   :  { %v362_v45 = vld [vmem:[%s696_s0 + $0x2f] sm:$0x2]   ;;  %v330_v47 = vld [vmem:[%s696_s0 + $0x1f] sm:$0x2]   ;;  %v364_v52 = vld [vmem:[%s696_s0 + $0x2e] sm:$0x2]  }
   0xf   :  { %v6_v49 = vsel %vm5_vm0, %v330_v47, %v2_v46  ;;  %v164_v50 = vsel %vm5_vm0, %v362_v45, %v361_v44  ;;  %v365_v53 = vld [vmem:[%s696_s0 + $0xe] sm:$0x1]   ;;  %s440_s10 = smov 64   ;;  %v174_v55 = vsel %vm5_vm0, %v364_v52, %v363_v51  ;;  %v367_v57 = vld [vmem:[%s696_s0 + $0xd] sm:$0x1]   ;;  %s441_s19 = smov 60  }
  0x10   :  { %75 = vrot.lane.b32.xlu0 %v74_v22, %s431_s23  ;;  %85 = vrot.lane.b32.xlu1 %v84_v23, %s432_s24  ;;  %s437_s24 = smov 76   ;;  %8 = vst.msk [vmem:[#allocation0] ss:$8 sm:$0x3] %vm7_vm1, %v6_v49   ;;  %v366_v54 = vld [vmem:[%s696_s0 + $0x2d] sm:$0x2]  }
  0x11   :  { %v184_v56 = vsel %vm5_vm0, %v366_v54, %v365_v53  ;;  %v368_v58 = vld [vmem:[%s696_s0 + $0x2c] sm:$0x2]   ;;  %v369_v59 = vld [vmem:[%s696_s0 + $0xc] sm:$0x1]   ;;  %s442_s20 = smov 56   ;;  %s444_s30 = smov 48  }
  0x12   :  { %v370_v60 = vld [vmem:[%s696_s0 + $0x2b] sm:$0x2]   ;;  %v194_v61 = vsel %vm5_vm0, %v368_v58, %v367_v57  ;;  %v371_v63 = vld [vmem:[%s696_s0 + $0xb] sm:$0x1]   ;;  %v373_v1 = vld [vmem:[%s696_s0 + $0xa] sm:$0x1]  }
  0x13   :  { %v204_v62 = vsel %vm5_vm0, %v370_v60, %v369_v59  ;;  %v372_v0 = vld [vmem:[%s696_s0 + $0x2a] sm:$0x2]   ;;  %v374_v2 = vld [vmem:[%s696_s0 + $0x29] sm:$0x2]   ;;  %v375_v5 = vld [vmem:[%s696_s0 + $0x9] sm:$0x1]  }
  0x14   :  { %95 = vrot.lane.b32.xlu0 %v94_v28, %s433_s4  ;;  %105 = vrot.lane.b32.xlu1 %v104_v29, %s434_s5  ;;  %v214_v3 = vsel %vm5_vm0, %v372_v0, %v371_v63  ;;  %v224_v4 = vsel %vm5_vm0, %v374_v2, %v373_v1  ;;  %v376_v6 = vld [vmem:[%s696_s0 + $0x28] sm:$0x2]   ;;  %v377_v7 = vld [vmem:[%s696_s0 + $0x8] sm:$0x1]   ;;  %s446_s11 = smov 40   ;;  %s448_s21 = smov 32  }
  0x15   :  { %v378_v8 = vld [vmem:[%s696_s0 + $0x27] sm:$0x2]   ;;  %v234_v9 = vsel %vm5_vm0, %v376_v6, %v375_v5  ;;  %v379_v11 = vld [vmem:[%s696_s0 + $0x7] sm:$0x1]   ;;  %v381_v13 = vld [vmem:[%s696_s0 + $0x6] sm:$0x1]  }
  0x16   :  { %v244_v10 = vsel %vm5_vm0, %v378_v8, %v377_v7  ;;  %v380_v12 = vld [vmem:[%s696_s0 + $0x26] sm:$0x2]   ;;  %v382_v14 = vld [vmem:[%s696_s0 + $0x25] sm:$0x2]   ;;  %v383_v17 = vld [vmem:[%s696_s0 + $0x5] sm:$0x1]  }
  0x17   :  { %v254_v15 = vsel %vm5_vm0, %v380_v12, %v379_v11  ;;  %v264_v16 = vsel %vm5_vm0, %v382_v14, %v381_v13  ;;  %v384_v18 = vld [vmem:[%s696_s0 + $0x24] sm:$0x2]   ;;  %v385_v19 = vld [vmem:[%s696_s0 + $0x4] sm:$0x1]   ;;  %s450_s2 = smov 24   ;;  %s452_s12 = smov 16  }
  0x18   :  { %115 = vrot.lane.b32.xlu0 %v114_v34, %s435_s14  ;;  %125 = vrot.lane.b32.xlu1 %v124_v35, %s436_s15  ;;  %v386_v20 = vld [vmem:[%s696_s0 + $0x23] sm:$0x2]   ;;  %v274_v21 = vsel %vm5_vm0, %v384_v18, %v383_v17  ;;  %v387_v23 = vld [vmem:[%s696_s0 + $0x3] sm:$0x1]   ;;  %s454_s17 = smov 8   ;;  %s455_s18 = smov 4  }
  0x19   :  { %v284_v22 = vsel %vm5_vm0, %v386_v20, %v385_v19  ;;  %v388_v24 = vld [vmem:[%s696_s0 + $0x22] sm:$0x2]   ;;  %v389_v25 = vld [vmem:[%s696_s0 + $0x2] sm:$0x1]   ;;  %v391_v29 = vld [vmem:[%s696_s0 + $0x1] sm:$0x1]  }
  0x1a   :  { %v390_v26 = vld [vmem:[%s696_s0 + $0x21] sm:$0x2]   ;;  %v294_v27 = vsel %vm5_vm0, %v388_v24, %v387_v23  ;;  %v392_v30 = vld [vmem:[%s696_s0 + $0x20] sm:$0x2]   ;;  %s453_s0 = smov 12   ;;  %vm37_vm4 = vcmask 982944  }
  0x1b   :  { %v304_v28 = vsel %vm5_vm0, %v390_v26, %v389_v25  ;;  %v314_v31 = vsel %vm5_vm0, %v392_v30, %v391_v29  ;;  %vm47_vm5 = vcmask 950144   ;;  %vm57_vm6 = vcmask 917344  }
  0x1c   :  { %135 = vrot.lane.b32.xlu0 %v134_v40, %s437_s24  ;;  %145 = vrot.lane.b32.xlu1 %v144_v41, %s438_s29  ;;  %s443_s29 = smov 52   ;;  %vm67_vm7 = vcmask 884544   ;;  %vm77_vm8 = vcmask 851744   ;;  %vm87_vm9 = vcmask 818944   ;;  %vm97_vm10 = vcmask 786144  }
  0x1d   :  { %vm107_vm11 = vcmask 753344   ;;  %vm117_vm12 = vcmask 720544   ;;  %vm127_vm13 = vcmask 687744   ;;  %vm137_vm14 = vcmask 654944  }
  0x1e   :  { %vm147_vm15 = vcmask 622144   ;;  %vm157_vm0 = vcmask 589344   ;;  %vm167_vm1 = vcmask 556544  }
  0x20   :  { %155 = vrot.lane.b32.xlu0 %v154_v48, %s439_s9  ;;  %165 = vrot.lane.b32.xlu1 %v164_v50, %s440_s10  ;;  %s445_s10 = smov 44  }
  0x24   :  { %175 = vrot.lane.b32.xlu0 %v174_v55, %s441_s19  ;;  %185 = vrot.lane.b32.xlu1 %v184_v56, %s442_s20  ;;  %s447_s20 = smov 36  }
  0x28   :  { %195 = vrot.lane.b32.xlu0 %v194_v61, %s443_s29  ;;  %205 = vrot.lane.b32.xlu1 %v204_v62, %s444_s30  ;;  %s449_s30 = smov 28  }
  0x2c   :  { %215 = vrot.lane.b32.xlu0 %v214_v3, %s445_s10  ;;  %225 = vrot.lane.b32.xlu1 %v224_v4, %s446_s11  ;;  %s451_s11 = smov 20  }
  0x30   :  { %235 = vrot.lane.b32.xlu0 %v234_v9, %s447_s20  ;;  %245 = vrot.lane.b32.xlu1 %v244_v10, %s448_s21 }
  0x34   :  { %255 = vrot.lane.b32.xlu0 %v254_v15, %s449_s30  ;;  %265 = vrot.lane.b32.xlu1 %v264_v16, %s450_s2 }
  0x38   :  { %275 = vrot.lane.b32.xlu0 %v274_v21, %s451_s11  ;;  %285 = vrot.lane.b32.xlu1 %v284_v22, %s452_s12 }
  0x3c   :  { %295 = vrot.lane.b32.xlu0 %v294_v27, %s453_s0  ;;  %305 = vrot.lane.b32.xlu1 %v304_v28, %s454_s17 }
  0x40   :  { %315 = vrot.lane.b32.xlu0 %v314_v31, %s455_s18 }
  0x76   :  { %v16_v32 = vpop.permute.xlu0 %15   ;;  %v36_v33 = vpop.permute.xlu1 %35  }
  0x77   :  { %18 = vst.msk [vmem:[#allocation0] ss:$8 sm:$0x3] %vm17_vm2, %v16_v32   ;;  %vm177_vm2 = vcmask 523744  }
  0x7a   :  { %v26_v34 = vpop.permute.xlu0 %25   ;;  %v46_v35 = vpop.permute.xlu1 %45  }
  0x7b   :  { %28 = vst.msk [vmem:[#allocation0] ss:$8 sm:$0x3] %vm27_vm3, %v26_v34   ;;  %vm187_vm3 = vcmask 490944  }
  0x7c   :  { %38 = vst.msk [vmem:[#allocation0] ss:$8 sm:$0x3] %vm37_vm4, %v36_v33   ;;  %vm197_vm4 = vcmask 458144  }
  0x7d   :  { %48 = vst.msk [vmem:[#allocation0] ss:$8 sm:$0x3] %vm47_vm5, %v46_v35   ;;  %vm207_vm5 = vcmask 425344  }
  0x7e   :  { %v56_v36 = vpop.permute.xlu0 %55   ;;  %v66_v37 = vpop.permute.xlu1 %65  }
  0x7f   :  { %58 = vst.msk [vmem:[#allocation0] ss:$8 sm:$0x3] %vm57_vm6, %v56_v36   ;;  %vm217_vm6 = vcmask 392544  }
  0x80   :  { %68 = vst.msk [vmem:[#allocation0] ss:$8 sm:$0x3] %vm67_vm7, %v66_v37   ;;  %vm227_vm7 = vcmask 359744  }
  0x82   :  { %v76_v38 = vpop.permute.xlu0 %75   ;;  %v86_v39 = vpop.permute.xlu1 %85  }
  0x83   :  { %78 = vst.msk [vmem:[#allocation0] ss:$8 sm:$0x3] %vm77_vm8, %v76_v38   ;;  %vm237_vm8 = vcmask 326944  }
  0x84   :  { %88 = vst.msk [vmem:[#allocation0] ss:$8 sm:$0x3] %vm87_vm9, %v86_v39   ;;  %vm247_vm9 = vcmask 294144  }
  0x86   :  { %v96_v40 = vpop.permute.xlu0 %95   ;;  %v106_v41 = vpop.permute.xlu1 %105  }
  0x87   :  { %98 = vst.msk [vmem:[#allocation0] ss:$8 sm:$0x3] %vm97_vm10, %v96_v40   ;;  %vm257_vm10 = vcmask 261344  }
  0x88   :  { %108 = vst.msk [vmem:[#allocation0] ss:$8 sm:$0x3] %vm107_vm11, %v106_v41   ;;  %vm267_vm11 = vcmask 228544  }
  0x8a   :  { %v116_v42 = vpop.permute.xlu0 %115   ;;  %v126_v43 = vpop.permute.xlu1 %125  }
  0x8b   :  { %118 = vst.msk [vmem:[#allocation0] ss:$8 sm:$0x3] %vm117_vm12, %v116_v42   ;;  %vm277_vm12 = vcmask 195744  }
  0x8c   :  { %128 = vst.msk [vmem:[#allocation0] ss:$8 sm:$0x3] %vm127_vm13, %v126_v43   ;;  %vm287_vm13 = vcmask 162944  }
  0x8e   :  { %v136_v44 = vpop.permute.xlu0 %135   ;;  %v146_v45 = vpop.permute.xlu1 %145  }
  0x8f   :  { %138 = vst.msk [vmem:[#allocation0] ss:$8 sm:$0x3] %vm137_vm14, %v136_v44   ;;  %vm297_vm14 = vcmask 130144  }
  0x90   :  { %148 = vst.msk [vmem:[#allocation0] ss:$8 sm:$0x3] %vm147_vm15, %v146_v45   ;;  %vm307_vm15 = vcmask 97344  }
  0x92   :  { %v156_v46 = vpop.permute.xlu0 %155   ;;  %v166_v47 = vpop.permute.xlu1 %165  }
  0x93   :  { %158 = vst.msk [vmem:[#allocation0] ss:$8 sm:$0x3] %vm157_vm0, %v156_v46   ;;  %vm317_vm0 = vcmask 64544  }
  0x94   :  { %168 = vst.msk [vmem:[#allocation0] ss:$8 sm:$0x3] %vm167_vm1, %v166_v47  }
  0x96   :  { %v176_v48 = vpop.permute.xlu0 %175   ;;  %v186_v49 = vpop.permute.xlu1 %185  }
  0x97   :  { %178 = vst.msk [vmem:[#allocation0] ss:$8 sm:$0x3] %vm177_vm2, %v176_v48  }
  0x98   :  { %188 = vst.msk [vmem:[#allocation0] ss:$8 sm:$0x3] %vm187_vm3, %v186_v49  }
  0x9a   :  { %v196_v50 = vpop.permute.xlu0 %195   ;;  %v206_v51 = vpop.permute.xlu1 %205  }
  0x9b   :  { %198 = vst.msk [vmem:[#allocation0] ss:$8 sm:$0x3] %vm197_vm4, %v196_v50  }
  0x9c   :  { %208 = vst.msk [vmem:[#allocation0] ss:$8 sm:$0x3] %vm207_vm5, %v206_v51  }
  0x9e   :  { %v216_v52 = vpop.permute.xlu0 %215   ;;  %v226_v53 = vpop.permute.xlu1 %225  }
  0x9f   :  { %218 = vst.msk [vmem:[#allocation0] ss:$8 sm:$0x3] %vm217_vm6, %v216_v52  }
  0xa0   :  { %228 = vst.msk [vmem:[#allocation0] ss:$8 sm:$0x3] %vm227_vm7, %v226_v53  }
  0xa2   :  { %v236_v54 = vpop.permute.xlu0 %235   ;;  %v246_v55 = vpop.permute.xlu1 %245  }
  0xa3   :  { %238 = vst.msk [vmem:[#allocation0] ss:$8 sm:$0x3] %vm237_vm8, %v236_v54  }
  0xa4   :  { %248 = vst.msk [vmem:[#allocation0] ss:$8 sm:$0x3] %vm247_vm9, %v246_v55  }
  0xa6   :  { %v256_v56 = vpop.permute.xlu0 %255   ;;  %v266_v57 = vpop.permute.xlu1 %265  }
  0xa7   :  { %258 = vst.msk [vmem:[#allocation0] ss:$8 sm:$0x3] %vm257_vm10, %v256_v56  }
  0xa8   :  { %268 = vst.msk [vmem:[#allocation0] ss:$8 sm:$0x3] %vm267_vm11, %v266_v57  }
  0xaa   :  { %v276_v58 = vpop.permute.xlu0 %275   ;;  %v286_v59 = vpop.permute.xlu1 %285  }
  0xab   :  { %278 = vst.msk [vmem:[#allocation0] ss:$8 sm:$0x3] %vm277_vm12, %v276_v58  }
  0xac   :  { %288 = vst.msk [vmem:[#allocation0] ss:$8 sm:$0x3] %vm287_vm13, %v286_v59  }
  0xae   :  { %v296_v60 = vpop.permute.xlu0 %295   ;;  %v306_v61 = vpop.permute.xlu1 %305  }
  0xaf   :  { %298 = vst.msk [vmem:[#allocation0] ss:$8 sm:$0x3] %vm297_vm14, %v296_v60  }
  0xb0   :  { %308 = vst.msk [vmem:[#allocation0] ss:$8 sm:$0x3] %vm307_vm15, %v306_v61  }
  0xb2   :  { %v316_v62 = vpop.permute.xlu0 %315  }
  0xb3   :  { %318 = vst.msk [vmem:[#allocation0] ss:$8 sm:$0x3] %vm317_vm0, %v316_v62  }
  0xba   :  { %v322_v63 = vld [vmem:[#allocation0] sm:$0x1]  ;;  %v326_v0 = vld [vmem:[#allocation0 + $0x8] sm:$0x1] }
  0xbb   :  { %324 = vst [vmem:[%s697_s1] sm:$0x1] %v322_v63  ;;  %393 = vst [vmem:[%s697_s1 + $0x1] sm:$0x1] %v326_v0 }

// kernel: decoder_block_forward.1
= control target key start
LH: loop header
LB: loop body
LE: loop exit
PB: predicated region body
PF: predicated region fallthrough
CT: control target
= control target key end

     0   :  { %s3951_s24 = smov 0   ;;  %s5101_s0 = inlined_call_operand.vmem [shape: f32[4,16,64], index: 0, kind: input, shape index: {}]   ;;  %s5102_s1 = inlined_call_operand.vmem [shape: bf16[64,256], index: 1, kind: input, shape index: {}]   ;;  %s5103_s2 = inlined_call_operand.vmem [shape: f32[1,256], index: 2, kind: input, shape index: {}]   ;;  %s5104_s3 = inlined_call_operand.vmem [shape: bf16[768,256], index: 3, kind: input, shape index: {}]   ;;  %s5105_s4 = inlined_call_operand.vmem [shape: f32[1,256], index: 4, kind: input, shape index: {}]   ;;  %s5106_s5 = inlined_call_operand.vmem [shape: bf16[768,512], index: 5, kind: input, shape index: {}]   ;;  %s5107_s6 = inlined_call_operand.vmem [shape: f32[1,512], index: 6, kind: input, shape index: {}]   ;;  %s5108_s7 = inlined_call_operand.vmem [shape: f32[4,16,512], index: 7, kind: output, shape index: {}]  }
   0x1 LB: > { %s2990_s25 = sadd.s32 4294967295, %s3907_s24   ;;  %p2994_p0 = scmp.ge.s32.totalorder %s3907_s24, 1  ;;  %s3907_s24 = sphi %s3951_s24, %s17_s24  }
   0x2   : > { %p239_p1 = scmp.lt.s32.totalorder %s3907_s24, 3 }
   0x4   : > { %p240_p2 = pnand %p2994_p0, %p239_p1 }
   0x5   : > { %v3457_v0 = vld [vmem:[%s5102_s1 + $0x4] ss:$8 sps:$4 sm:$0xff] (!%p240_p2)   ;;  %s2995_s28 = sshll.u32 (!%p240_p2), %s2990_s25, 1  ;;  %v3459_v1 = vld [vmem:[%s5102_s1] ss:$8 sps:$4 sm:$0xff] (!%p240_p2)   ;;  %v3909_v2 = vmov (!%p240_p2), 0  }
   0x6   : > { %243 = sbr.rel (%p240_p2) target bundleno = 888 (0x378), region = 48  ;;  %393 = vmatprep.mubr.bf16.mxu0 (!%p240_p2), %v3909_v2  ;;  %p274_p3 = scmp.lt.s32.totalorder (!%p240_p2), %s2995_s28, 3  ;;  %361 = vmatprep.subr.bf16.mxu0 (!%p240_p2), %v3457_v0  ;;  %v3460_v3 = vld [vmem:[%s5102_s1 + $0x14] ss:$8 sps:$4 sm:$0xff] (!%p240_p2)   ;;  %v3462_v4 = vld [vmem:[%s5102_s1 + $0x10] ss:$8 sps:$4 sm:$0xff] (!%p240_p2)  }
   0x7   : > { %362 = vmatpush1.bf16.msra.mxu0 (!%p240_p2), %v3459_v1  ;;  %v3463_v5 = vld [vmem:[%s5102_s1 + $0x24] ss:$8 sps:$4 sm:$0xff] (!%p240_p2)   ;;  %v3471_v7 = vld [vmem:[%s5104_s3 + $0x100] ss:$8 sps:$4 sm:$0xff] (!%p240_p2)   ;;  %v3466_v9 = vld [vmem:[%s5102_s1 + $0x34] ss:$8 sps:$4 sm:$0xff] (!%p240_p2)  }
   0x8   : > { %363 = vmatprep.subr.bf16.mxu0 (!%p240_p2), %v3460_v3  ;;  %v3469_v6 = vld [vmem:[%s5104_s3 + $0x104] ss:$8 sps:$4 sm:$0xff] (!%p240_p2)   ;;  %v3465_v8 = vld [vmem:[%s5102_s1 + $0x20] ss:$8 sps:$4 sm:$0xff] (!%p240_p2)   ;;  %v3468_v10 = vld [vmem:[%s5102_s1 + $0x30] ss:$8 sps:$4 sm:$0xff] (!%p240_p2)  }
   0x9   : > { %1226 = vmatprep.subr.bf16.mxu1 (!%p240_p2), %v3469_v6  ;;  %v3475_v12 = vld [vmem:[%s5104_s3 + $0x114] ss:$8 sps:$4 sm:$0xff] (!%p240_p2)   ;;  %v3477_v13 = vld [vmem:[%s5104_s3 + $0x110] ss:$8 sps:$4 sm:$0xff] (!%p240_p2)   ;;  %v3474_v15 = vld [vmem:[%s5104_s3 + $0x4] ss:$8 sps:$4 sm:$0xff] (!%p240_p2)  }
   0xa   : > { %1227 = vmatpush1.bf16.msra.mxu1 (!%p240_p2), %v3471_v7  ;;  %v3481_v16 = vld [vmem:[%s5104_s3 + $0x124] ss:$8 sps:$4 sm:$0xff] (!%p240_p2)   ;;  %v3483_v17 = vld [vmem:[%s5104_s3 + $0x120] ss:$8 sps:$4 sm:$0xff] (!%p240_p2)   ;;  %vm354_vm0 = vcmask (!%p240_p2), 523264   ;;  %vm491_vm1 = vcmask (!%p240_p2), 1040384  }
   0xb   : > { %364 = vmatpush1.bf16.msra.mxu0 (!%p240_p2), %v3462_v4  ;;  %1228 = vmatprep.subr.bf16.mxu1 (!%p240_p2), %v3475_v12  ;;  %v3472_v19 = vld [vmem:[%s5104_s3] ss:$8 sps:$4 sm:$0xff] (!%p240_p2)   ;;  %v3487_v20 = vld [vmem:[%s5104_s3 + $0x134] ss:$8 sps:$4 sm:$0xff] (!%p240_p2)   ;;  %v3489_v22 = vld [vmem:[%s5104_s3 + $0x130] ss:$8 sps:$4 sm:$0xff] (!%p240_p2)  }
   0xc   : > { %365 = vmatprep.subr.bf16.mxu0 (!%p240_p2), %v3463_v5  ;;  %v3480_v21 = vld [vmem:[%s5104_s3 + $0x14] ss:$8 sps:$4 sm:$0xff] (!%p240_p2)   ;;  %v3493_v24 = vld [vmem:[%s5104_s3 + $0x144] ss:$8 sps:$4 sm:$0xff] (!%p240_p2)   ;;  %v3478_v26 = vld [vmem:[%s5104_s3 + $0x10] ss:$8 sps:$4 sm:$0xff] (!%p240_p2)  }
   0xd   : > { %s5124_s28 = smov (!%p274_p3, %s2995_s28), 3  ;;  %v3486_v27 = vld [vmem:[%s5104_s3 + $0x24] ss:$8 sps:$4 sm:$0xff]   ;;  %v3495_v28 = vld [vmem:[%s5104_s3 + $0x140] ss:$8 sps:$4 sm:$0xff]   ;;  %vm532_vm2 = vcmask 1046528  }
   0xe   : > { %s3373_s14 = sshll.u32 %s5124_s28, 4  ;;  %1229 = vmatpush1.bf16.msra.mxu1 %v3477_v13  ;;  %v3499_v30 = vld [vmem:[%s5104_s3 + $0x154] ss:$8 sps:$4 sm:$0xff]   ;;  %v3484_v31 = vld [vmem:[%s5104_s3 + $0x20] ss:$8 sps:$4 sm:$0xff]   ;;  %vm3910_vm4 = vmmov 1  }
   0xf   : > { %s3980_s17 = scalar_lea.vmem %s5101_s0, %s3373_s14  ;;  %366 = vmatpush1.bf16.msra.mxu0 %v3465_v8  ;;  %1230 = vmatprep.subr.bf16.mxu1 %v3481_v16  ;;  %v3492_v32 = vld [vmem:[%s5104_s3 + $0x34] ss:$8 sps:$4 sm:$0xff]   ;;  %v3501_v33 = vld [vmem:[%s5104_s3 + $0x150] ss:$8 sps:$4 sm:$0xff]   ;;  %v3505_v34 = vld [vmem:[%s5104_s3 + $0x164] ss:$8 sps:$4 sm:$0xff]   ;;  %v304_v16 = vlaneseq }
  0x10   : > { %v288_v11 = vld [vmem:[%s3980_s17] sm:$0xff]  ;;  %v289_v14 = vld [vmem:[%s3980_s17 + $0x8] sm:$0xff]  ;;  %367 = vmatprep.subr.bf16.mxu0 %v3466_v9  ;;  %v290_v23 = vld [vmem:[%s3980_s17 + $0x10] sm:$0xff]  ;;  %s3374_s19 = sshll.u32 %s5124_s28, 6 }
  0x11   : > { %v292_v18 = vpack.c.bf16 %v289_v14, %v288_v11  ;;  %v291_v25 = vld [vmem:[%s3980_s17 + $0x18] sm:$0xff]  ;;  %v3498_v36 = vld [vmem:[%s5104_s3 + $0x44] ss:$8 sps:$4 sm:$0xff]   ;;  %v3507_v37 = vld [vmem:[%s5104_s3 + $0x160] ss:$8 sps:$4 sm:$0xff]   ;;  %s5080_s22 = scalar_lea.vmem %s5108_s7, %s3374_s19 }
  0x12   : > { %1231 = vmatpush1.bf16.msra.mxu1 %v3483_v17  ;;  %v293_v29 = vpack.c.bf16 %v291_v25, %v290_v23  ;;  %v3490_v35 = vld [vmem:[%s5104_s3 + $0x30] ss:$8 sps:$4 sm:$0xff]   ;;  %v3511_v38 = vld [vmem:[%s5104_s3 + $0x174] ss:$8 sps:$4 sm:$0xff]   ;;  %v3496_v39 = vld [vmem:[%s5104_s3 + $0x40] ss:$8 sps:$4 sm:$0xff]  }
  0x13   : > { %368 = vmatpush1.bf16.msra.mxu0 %v3468_v10  ;;  %1232 = vmatprep.subr.bf16.mxu1 %v3487_v20  ;;  %v3504_v40 = vld [vmem:[%s5104_s3 + $0x54] ss:$8 sps:$4 sm:$0xff]   ;;  %v3513_v41 = vld [vmem:[%s5104_s3 + $0x170] ss:$8 sps:$4 sm:$0xff]   ;;  %v3517_v42 = vld [vmem:[%s5104_s3 + $0x184] ss:$8 sps:$4 sm:$0xff]  }
  0x14   : > { %1173 = vmatprep.subr.bf16.mxu0 %v3474_v15  ;;  %v3502_v43 = vld [vmem:[%s5104_s3 + $0x50] ss:$8 sps:$4 sm:$0xff]   ;;  %v3510_v44 = vld [vmem:[%s5104_s3 + $0x64] ss:$8 sps:$4 sm:$0xff]   ;;  %v3519_v45 = vld [vmem:[%s5104_s3 + $0x180] ss:$8 sps:$4 sm:$0xff]  }
  0x15   : > { %v3523_v46 = vld [vmem:[%s5104_s3 + $0x194] ss:$8 sps:$4 sm:$0xff]   ;;  %v3508_v47 = vld [vmem:[%s5104_s3 + $0x60] ss:$8 sps:$4 sm:$0xff]   ;;  %v3525_v49 = vld [vmem:[%s5104_s3 + $0x190] ss:$8 sps:$4 sm:$0xff]  }
  0x16   : > { %3009 = vmatmul.mubr.msk.bf16.vlgmr.msra.gmra.mrb[0].mxu0 %vm354_vm0, %v292_v18  ;;  %1233 = vmatpush1.bf16.msra.mxu1 %v3489_v22  ;;  %v3516_v48 = vld [vmem:[%s5104_s3 + $0x74] ss:$8 sps:$4 sm:$0xff]   ;;  %v3514_v50 = vld [vmem:[%s5104_s3 + $0x70] ss:$8 sps:$4 sm:$0xff]   ;;  %v3522_v51 = vld [vmem:[%s5104_s3 + $0x84] ss:$8 sps:$4 sm:$0xff]  }
  0x17   : > { %403 = vmatprep.mubr.bf16.mxu0 %v3909_v2  ;;  %1174 = vmatpush1.bf16.msra.mxu0 %v3472_v19  ;;  %v3529_v52 = vld [vmem:[%s5104_s3 + $0x1a4] ss:$8 sps:$4 sm:$0xff]   ;;  %v3531_v53 = vld [vmem:[%s5104_s3 + $0x1a0] ss:$8 sps:$4 sm:$0xff]   ;;  %v3535_v54 = vld [vmem:[%s5104_s3 + $0x1b4] ss:$8 sps:$4 sm:$0xff]  }
  0x18   : > { %1175 = vmatprep.subr.bf16.mxu0 %v3480_v21  ;;  %1234 = vmatprep.subr.bf16.mxu1 %v3493_v24  ;;  %v3520_v55 = vld [vmem:[%s5104_s3 + $0x80] ss:$8 sps:$4 sm:$0xff]   ;;  %v3528_v56 = vld [vmem:[%s5104_s3 + $0x94] ss:$8 sps:$4 sm:$0xff]   ;;  %v3537_v57 = vld [vmem:[%s5104_s3 + $0x1b0] ss:$8 sps:$4 sm:$0xff]  }
  0x19   : > { %v3541_v58 = vld [vmem:[%s5104_s3 + $0x1c4] ss:$8 sps:$4 sm:$0xff]   ;;  %v3526_v59 = vld [vmem:[%s5104_s3 + $0x90] ss:$8 sps:$4 sm:$0xff]   ;;  %v3543_v61 = vld [vmem:[%s5104_s3 + $0x1c0] ss:$8 sps:$4 sm:$0xff]  }
  0x1a   : > { %1235 = vmatpush1.bf16.msra.mxu1 %v3495_v28  ;;  %v3534_v60 = vld [vmem:[%s5104_s3 + $0xa4] ss:$8 sps:$4 sm:$0xff]   ;;  %v3547_v62 = vld [vmem:[%s5104_s3 + $0x1d4] ss:$8 sps:$4 sm:$0xff]   ;;  %v3532_v63 = vld [vmem:[%s5104_s3 + $0xa0] ss:$8 sps:$4 sm:$0xff]  }
  0x1b   : > { %1176 = vmatpush1.bf16.msra.mxu0 %v3478_v26  ;;  %1236 = vmatprep.subr.bf16.mxu1 %v3499_v30  ;;  %v3540_v0 = vld [vmem:[%s5104_s3 + $0xb4] ss:$8 sps:$4 sm:$0xff]   ;;  %v3549_v1 = vld [vmem:[%s5104_s3 + $0x1d0] ss:$8 sps:$4 sm:$0xff]   ;;  %v3546_v3 = vld [vmem:[%s5104_s3 + $0xc4] ss:$8 sps:$4 sm:$0xff]  }
  0x1c   : > { %1177 = vmatprep.subr.bf16.mxu0 %v3486_v27  ;;  %v3538_v2 = vld [vmem:[%s5104_s3 + $0xb0] ss:$8 sps:$4 sm:$0xff]   ;;  %v3544_v4 = vld [vmem:[%s5104_s3 + $0xc0] ss:$8 sps:$4 sm:$0xff]   ;;  %v3552_v5 = vld [vmem:[%s5104_s3 + $0xd4] ss:$8 sps:$4 sm:$0xff]  }
  0x1d   : > { %v3553_v6 = vld [vmem:[%s5104_s3 + $0x1e4] ss:$8 sps:$4 sm:$0xff]   ;;  %v3550_v7 = vld [vmem:[%s5104_s3 + $0xd0] ss:$8 sps:$4 sm:$0xff]   ;;  %v3555_v8 = vld [vmem:[%s5104_s3 + $0x1e0] ss:$8 sps:$4 sm:$0xff]  }
  0x1e   : > { %3010 = vmatmul.mubr.msk.bf16.gmra.mrb[4].mxu0 %vm354_vm0, %v293_v29  ;;  %1237 = vmatpush1.bf16.msra.mxu1 %v3501_v33  ;;  %v3558_v9 = vld [vmem:[%s5104_s3 + $0xe4] ss:$8 sps:$4 sm:$0xff]   ;;  %v3559_v10 = vld [vmem:[%s5104_s3 + $0x1f4] ss:$8 sps:$4 sm:$0xff]   ;;  %v3556_v11 = vld [vmem:[%s5104_s3 + $0xe0] ss:$8 sps:$4 sm:$0xff]  }
  0x1f   : > { %1178 = vmatpush1.bf16.msra.mxu0 %v3484_v31  ;;  %1238 = vmatprep.subr.bf16.mxu1 %v3505_v34  ;;  %v3561_v12 = vld [vmem:[%s5104_s3 + $0x1f0] ss:$8 sps:$4 sm:$0xff]   ;;  %v3564_v13 = vld [vmem:[%s5104_s3 + $0xf4] ss:$8 sps:$4 sm:$0xff]   ;;  %v3567_v14 = vld [vmem:[%s5104_s3 + $0x204] ss:$8 sps:$4 sm:$0xff]  }
  0x20   : > { %1179 = vmatprep.subr.bf16.mxu0 %v3492_v32  ;;  %v3562_v15 = vld [vmem:[%s5104_s3 + $0xf0] ss:$8 sps:$4 sm:$0xff]   ;;  %v4192_v17 = vshrl.u32 %v304_v16, 7  ;;  %v302_v19 = vld [vmem:[%s5103_s2] sm:$0x3] }
  0x22   : > { %1239 = vmatpush1.bf16.msra.mxu1 %v3507_v37  ;;  %v4195_v18 = vsub.s32 0, %v4192_v17  ;;  %v4201_v20 = vsub.s32 1, %v4192_v17  ;;  %v423_v24 = vand.u32 15, %v4192_v17  ;;  %v416_v27 = vadd.s32 8, %v4192_v17 }
  0x23   : > { %1180 = vmatpush1.bf16.msra.mxu0 %v3490_v35  ;;  %1240 = vmatprep.subr.bf16.mxu1 %v3511_v38  ;;  %v417_v30 = vadd.s32 16, %v4192_v17 }
  0x24   : > { %1181 = vmatprep.subr.bf16.mxu0 %v3498_v36  ;;  %v307_v21 = vrot.slane %v302_v19, %v4195_v18  ;;  %v311_v22 = vrot.slane %v302_v19, %v4201_v20  ;;  %vm4208_vm3 = vcmp.ne.s32.totalorder %v423_v24, 0  ;;  %v3621_v19 = vld [vmem:[%s5106_s5 + $0x24] ss:$16 sps:$4 sm:$0xff]  }
  0x25   : > { %vm4238_vm5 = vmpackc.low %vm3910_vm4, %vm4208_vm3 }
  0x26   : > { %1241 = vmatpush1.bf16.msra.mxu1 %v3513_v41 }
  0x27   : > { %1182 = vmatpush1.bf16.msra.mxu0 %v3496_v39  ;;  %1242 = vmatprep.subr.bf16.mxu1 %v3517_v42  ;;  %v430_v39 = vand.u32 15, %v416_v27 }
  0x28   : > { %1183 = vmatprep.subr.bf16.mxu0 %v3504_v40 }
  0x29   : > { %vm4251_vm6 = vcmp.ne.s32.totalorder %v430_v39, 15  ;;  %v3738_v39 = vld [vmem:[%s5106_s5 + $0x28c] ss:$16 sps:$4 sm:$0xff]  }
  0x2a   : > { %1243 = vmatpush1.bf16.msra.mxu1 %v3519_v45  ;;  %vm4276_vm8 = vmpackc.low %vm4251_vm6, %vm3910_vm4 }
  0x2b   : > { %1184 = vmatpush1.bf16.msra.mxu0 %v3502_v43  ;;  %1244 = vmatprep.subr.bf16.mxu1 %v3523_v46  ;;  %v437_v43 = vand.u32 15, %v417_v30 }
  0x2c   : > { %1185 = vmatprep.subr.bf16.mxu0 %v3510_v44 }
  0x2d   : > { %vm4257_vm7 = vcmp.ne.s32.totalorder %v437_v43, 0 }
  0x2e   : > { %1245 = vmatpush1.bf16.msra.mxu1 %v3525_v49  ;;  %vm4292_vm9 = vmpackc.low %vm3910_vm4, %vm4257_vm7 }
  0x2f   : > { %1186 = vmatpush1.bf16.msra.mxu0 %v3508_v47  ;;  %1246 = vmatprep.subr.bf16.mxu1 %v3529_v52 }
  0x30   : > { %1187 = vmatprep.subr.bf16.mxu0 %v3516_v48 }
  0x32   : > { %1247 = vmatpush1.bf16.msra.mxu1 %v3531_v53  ;;  %v3565_v53 = vld [vmem:[%s5104_s3 + $0x200] ss:$8 sps:$4 sm:$0xff]  }
  0x33   : > { %1188 = vmatpush1.bf16.msra.mxu0 %v3514_v50  ;;  %1248 = vmatprep.subr.bf16.mxu1 %v3535_v54 }
  0x34   : > { %1189 = vmatprep.subr.bf16.mxu0 %v3522_v51 }
  0x36   : > { %1249 = vmatpush1.bf16.msra.mxu1 %v3537_v57 }
  0x37   : > { %1190 = vmatpush1.bf16.msra.mxu0 %v3520_v55  ;;  %1250 = vmatprep.subr.bf16.mxu1 %v3541_v58 }
  0x38   : > { %1191 = vmatprep.subr.bf16.mxu0 %v3528_v56 }
  0x3a   : > { %1251 = vmatpush1.bf16.msra.mxu1 %v3543_v61 }
  0x3b   : > { %1192 = vmatpush1.bf16.msra.mxu0 %v3526_v59  ;;  %1252 = vmatprep.subr.bf16.mxu1 %v3547_v62  ;;  %v3570_v59 = vld [vmem:[%s5104_s3 + $0x214] ss:$8 sps:$4 sm:$0xff]  }
  0x3c   : > { %1193 = vmatprep.subr.bf16.mxu0 %v3534_v60 }
  0x3e   : > { %1253 = vmatpush1.bf16.msra.mxu1 %v3549_v1 }
  0x3f   : > { %1194 = vmatpush1.bf16.msra.mxu0 %v3532_v63  ;;  %1254 = vmatprep.subr.bf16.mxu1 %v3553_v6 }
  0x40   : > { %1195 = vmatprep.subr.bf16.mxu0 %v3540_v0 }
  0x42   : > { %1255 = vmatpush1.bf16.msra.mxu1 %v3555_v8  ;;  %v3568_v8 = vld [vmem:[%s5104_s3 + $0x210] ss:$8 sps:$4 sm:$0xff]  }
  0x43   : > { %1196 = vmatpush1.bf16.msra.mxu0 %v3538_v2  ;;  %1256 = vmatprep.subr.bf16.mxu1 %v3559_v10 }
  0x44   : > { %1197 = vmatprep.subr.bf16.mxu0 %v3546_v3 }
  0x46   : > { %1257 = vmatpush1.bf16.msra.mxu1 %v3561_v12  ;;  %v3573_v12 = vld [vmem:[%s5104_s3 + $0x224] ss:$8 sps:$4 sm:$0xff]  }
  0x47   : > { %1198 = vmatpush1.bf16.msra.mxu0 %v3544_v4  ;;  %1279 = vmatprep.subr.bf16.mxu1 %v3567_v14 }
  0x48   : > { %1199 = vmatprep.subr.bf16.mxu0 %v3552_v5 }
  0x4b   : > { %1200 = vmatpush1.bf16.msra.mxu0 %v3550_v7 }
  0x4c   : > { %1201 = vmatprep.subr.bf16.mxu0 %v3558_v9 }
  0x4f   : > { %1202 = vmatpush1.bf16.msra.mxu0 %v3556_v11 }
  0x50   : > { %1203 = vmatprep.subr.bf16.mxu0 %v3564_v13  ;;  %v3615_v13 = vld [vmem:[%s5106_s5 + $0x4] ss:$16 sps:$4 sm:$0xff]  }
  0x53   : > { %1204 = vmatpush1.bf16.msra.mxu0 %v3562_v15 }
  0x54   : > { %2598 = vmatprep.subr.bf16.mxu0 %v3615_v13  ;;  %v3702_v13 = vld [vmem:[%s5106_s5 + $0x1cc] ss:$16 sps:$4 sm:$0xff]  }
  0xe9   : > { %v395_v23 = vpop.f32.mrb[0].mxu0 }
  0xea   : > { %v396_v25 = vadd.f32 %v395_v23, %v307_v21  ;;  %v397_v26 = vpop.f32.mrb[1].mxu0 }
  0xeb   : > { %v398_v28 = vadd.f32 %v397_v26, %v311_v22  ;;  %v399_v29 = vpop.f32.mrb[2].mxu0 }
  0xec   : > { %v475_v31 = vmax.f32 %v396_v25, 0.0  ;;  %v400_v32 = vadd.f32 %v399_v29, %v307_v21  ;;  %v401_v33 = vpop.f32.mrb[3].mxu0  ;;  %v3571_v29 = vld [vmem:[%s5104_s3 + $0x220] ss:$8 sps:$4 sm:$0xff]  }
  0xed   : > { %v476_v34 = vmax.f32 %v398_v28, 0.0  ;;  %v402_v35 = vadd.f32 %v401_v33, %v311_v22 }
  0xee   : > { %v492_v37 = vrot.slane %v475_v31, 7  ;;  %v4212_v38 = vmax.f32 %v400_v32, 0.0  ;;  %v533_v40 = vrot.slane %v475_v31, 1  ;;  %v1616_v32 = vld [vmem:[%s5107_s6] sm:$0xf] }
  0xef   : > { %v493_v41 = vrot.slane %v476_v34, 7  ;;  %v4214_v42 = vmax.f32 %v402_v35, 0.0  ;;  %v536_v44 = vrot.slane %v476_v34, 1  ;;  %v3576_v35 = vld [vmem:[%s5104_s3 + $0x234] ss:$8 sps:$4 sm:$0xff]  }
  0xf0   : > { %v494_v45 = vrot.slane %v4212_v38, 7  ;;  %v534_v46 = vrot.slane %v4212_v38, 1  ;;  %v575_v47 = vpack.c.bf16 %v4212_v38, %v475_v31  ;;  %v514_v48 = vsel %vm491_vm1, 0.0, %v492_v37 }
  0xf1   : > { %v496_v49 = vrot.slane %v4214_v42, 7  ;;  %v537_v50 = vrot.slane %v4214_v42, 1  ;;  %v405_v51 = vpop.f32.mrb[4].mxu0  ;;  %v576_v52 = vpack.c.bf16 %v4214_v42, %v476_v34  ;;  %v515_v54 = vsel %vm491_vm1, 0.0, %v493_v41 }
  0xf2   : > { %v495_v55 = vsel %vm491_vm1, %v492_v37, %v494_v45  ;;  %v4229_v56 = vsel %vm532_vm2, %v533_v40, %v534_v46  ;;  %v406_v57 = vadd.f32 %v405_v51, %v307_v21  ;;  %v407_v58 = vpop.f32.mrb[5].mxu0  ;;  %v3580_v51 = vld [vmem:[%s5104_s3 + $0x250] ss:$8 sps:$4 sm:$0xff]  }
  0xf3   : > { %v3111_v60 = vpack.c.bf16 %v495_v55, %v514_v48  ;;  %v408_v61 = vadd.f32 %v407_v58, %v311_v22  ;;  %v409_v62 = vpop.f32.mrb[6].mxu0  ;;  %1258 = vmatprep.mubr.bf16.mxu1 %v576_v52  ;;  %v497_v63 = vsel %vm491_vm1, %v493_v41, %v496_v49  ;;  %v538_v1 = vsel %vm532_vm2, %v536_v44, %v537_v50  ;;  %v3579_v48 = vld [vmem:[%s5104_s3 + $0x244] ss:$8 sps:$4 sm:$0xff]   ;;  %v3586_v55 = vld [vmem:[%s5104_s3 + $0x270] ss:$8 sps:$4 sm:$0xff]  }
  0xf4   : > { %v479_v2 = vmax.f32 %v406_v57, 0.0  ;;  %v410_v3 = vadd.f32 %v409_v62, %v307_v21  ;;  %v411_v4 = vpop.f32.mrb[7].mxu0  ;;  %1259 = vmatmul.mubr.bf16.vlgmr.msra.gmra.mrb[0].mxu1 %v575_v47  ;;  %v3108_v5 = vpack.c.bf16 %v497_v63, %v515_v54  ;;  %v3585_v52 = vld [vmem:[%s5104_s3 + $0x264] ss:$8 sps:$4 sm:$0xff]   ;;  %v3588_v54 = vld [vmem:[%s5104_s3 + $0x274] ss:$8 sps:$4 sm:$0xff]  }
  0xf5   : > { %v480_v6 = vmax.f32 %v408_v61, 0.0  ;;  %v412_v7 = vadd.f32 %v411_v4, %v311_v22  ;;  %1280 = vmatpush1.bf16.msra.mxu1 %v3565_v53  ;;  %v3583_v53 = vld [vmem:[%s5104_s3 + $0x260] ss:$8 sps:$4 sm:$0xff]   ;;  %v3591_v57 = vld [vmem:[%s5104_s3 + $0x284] ss:$8 sps:$4 sm:$0xff]  }
  0xf6   : > { %v498_v9 = vrot.slane %v479_v2, 7  ;;  %v539_v10 = vrot.slane %v479_v2, 1  ;;  %v481_v11 = vmax.f32 %v410_v3, 0.0  ;;  %3109 = vmatprep.mubr.msk.bf16.mxu0 %vm4238_vm5, %v3108_v5  ;;  %1281 = vmatprep.subr.bf16.mxu1 %v3570_v59  ;;  %v3589_v58 = vld [vmem:[%s5104_s3 + $0x280] ss:$8 sps:$4 sm:$0xff]  }
  0xf7   : > { %v500_v14 = vrot.slane %v480_v6, 7  ;;  %v541_v15 = vrot.slane %v480_v6, 1  ;;  %v482_v16 = vmax.f32 %v412_v7, 0.0  ;;  %3112 = vmatmul.mubr.msk.bf16.vlgmr.msra.gmra.mrb[8].mxu0 %vm4238_vm5, %v3111_v60  ;;  %v3594_v59 = vld [vmem:[%s5104_s3 + $0x294] ss:$8 sps:$4 sm:$0xff]   ;;  %v418_v7 = vadd.s32 24, %v4192_v17 }
  0xf8   : > { %v4262_v21 = vsel %vm532_vm2, %v534_v46, %v539_v10  ;;  %v502_v22 = vrot.slane %v481_v11, 7  ;;  %v543_v23 = vrot.slane %v481_v11, 1  ;;  %v581_v24 = vpack.c.bf16 %v481_v11, %v479_v2  ;;  %v3592_v60 = vld [vmem:[%s5104_s3 + $0x290] ss:$8 sps:$4 sm:$0xff]   ;;  %v3597_v61 = vld [vmem:[%s5104_s3 + $0x2a4] ss:$8 sps:$4 sm:$0xff]  }
  0xf9   : > { %v3123_v25 = vpack.c.bf16 %v4262_v21, %v4229_v56  ;;  %v504_v26 = vrot.slane %v482_v16, 7  ;;  %v545_v27 = vrot.slane %v482_v16, 1  ;;  %1282 = vmatpush1.bf16.msra.mxu1 %v3568_v8  ;;  %v582_v28 = vpack.c.bf16 %v482_v16, %v480_v6  ;;  %v3595_v62 = vld [vmem:[%s5104_s3 + $0x2a0] ss:$8 sps:$4 sm:$0xff]   ;;  %v3600_v63 = vld [vmem:[%s5104_s3 + $0x2b4] ss:$8 sps:$4 sm:$0xff]  }
  0xfa   : > { %v4270_v30 = vsel %vm532_vm2, %v543_v23, 0.0  ;;  %1283 = vmatprep.subr.bf16.mxu1 %v3573_v12  ;;  %v542_v31 = vsel %vm532_vm2, %v537_v50, %v541_v15  ;;  %v501_v33 = vsel %vm491_vm1, %v496_v49, %v500_v14  ;;  %v499_v34 = vsel %vm491_vm1, %v494_v45, %v498_v9  ;;  %v3574_v45 = vld [vmem:[%s5104_s3 + $0x230] ss:$8 sps:$4 sm:$0xff]   ;;  %v3577_v49 = vld [vmem:[%s5104_s3 + $0x240] ss:$8 sps:$4 sm:$0xff]  }
  0xfb   : > { %v4286_v36 = vsel %vm532_vm2, %v545_v27, 0.0  ;;  %1268 = vmatprep.mubr.bf16.mxu1 %v582_v28  ;;  %v3120_v37 = vpack.c.bf16 %v542_v31, %v538_v1  ;;  %v505_v38 = vsel %vm491_vm1, %v500_v14, %v504_v26  ;;  %v503_v40 = vsel %vm491_vm1, %v498_v9, %v502_v22  ;;  %v3582_v50 = vld [vmem:[%s5104_s3 + $0x254] ss:$8 sps:$4 sm:$0xff]   ;;  %v3598_v1 = vld [vmem:[%s5104_s3 + $0x2b0] ss:$8 sps:$4 sm:$0xff]  }
  0xfc   : > { %1269 = vmatmul.mubr.bf16.gmra.mrb[4].mxu1 %v581_v24  ;;  %v3114_v41 = vpack.c.bf16 %v505_v38, %v501_v33  ;;  %v3117_v42 = vpack.c.bf16 %v503_v40, %v499_v34  ;;  %v4298_v43 = vsel %vm532_vm2, %v541_v15, %v545_v27  ;;  %v4301_v44 = vsel %vm532_vm2, %v539_v10, %v543_v23  ;;  %v3603_v2 = vld [vmem:[%s5104_s3 + $0x2c4] ss:$8 sps:$4 sm:$0xff]   ;;  %v3601_v3 = vld [vmem:[%s5104_s3 + $0x2c0] ss:$8 sps:$4 sm:$0xff]   ;;  %v3606_v4 = vld [vmem:[%s5104_s3 + $0x2d4] ss:$8 sps:$4 sm:$0xff]  }
  0xfd   : > { %1284 = vmatpush1.bf16.msra.mxu1 %v3571_v29  ;;  %3121 = vmatprep.mubr.msk.bf16.mxu1 %vm4276_vm8, %v3120_v37  ;;  %v3126_v46 = vpack.c.bf16 %v4286_v36, %v4298_v43  ;;  %v3129_v47 = vpack.c.bf16 %v4270_v30, %v4301_v44  ;;  %v3604_v5 = vld [vmem:[%s5104_s3 + $0x2d0] ss:$8 sps:$4 sm:$0xff]   ;;  %v3609_v6 = vld [vmem:[%s5104_s3 + $0x2e4] ss:$8 sps:$4 sm:$0xff]   ;;  %v3607_v8 = vld [vmem:[%s5104_s3 + $0x2e0] ss:$8 sps:$4 sm:$0xff]  }
  0xfe   : > { %3115 = vmatprep.mubr.msk.bf16.mxu0 %vm4292_vm9, %v3114_v41  ;;  %1285 = vmatprep.subr.bf16.mxu1 %v3576_v35  ;;  %v3612_v9 = vld [vmem:[%s5104_s3 + $0x2f4] ss:$8 sps:$4 sm:$0xff]   ;;  %v444_v10 = vand.u32 15, %v418_v7  ;;  %v3610_v11 = vld [vmem:[%s5104_s3 + $0x2f0] ss:$8 sps:$4 sm:$0xff]  }
  0xff   : > { %3118 = vmatmul.mubr.msk.bf16.gmra.mrb[12].mxu0 %vm4292_vm9, %v3117_v42  ;;  %v3618_v14 = vld [vmem:[%s5106_s5 + $0xc] ss:$16 sps:$4 sm:$0xff]   ;;  %v3613_v56 = vld [vmem:[%s5106_s5] ss:$16 sps:$4 sm:$0xff]   ;;  %v3616_v15 = vld [vmem:[%s5106_s5 + $0x8] ss:$16 sps:$4 sm:$0xff]  }
 0x100   : > { %vm474_vm10 = vcmp.ne.s32.totalorder %v444_v10, 15  ;;  %2599 = vmatpush1.bf16.msra.mxu0 %v3613_v56  ;;  %v3619_v16 = vld [vmem:[%s5106_s5 + $0x20] ss:$16 sps:$4 sm:$0xff]   ;;  %v3622_v21 = vld [vmem:[%s5106_s5 + $0x28] ss:$16 sps:$4 sm:$0xff]  }
 0x101   : > { %1286 = vmatpush1.bf16.msra.mxu1 %v3574_v45  ;;  %vm4390_vm11 = vmpackc.low %vm474_vm10, %vm3910_vm4  ;;  %v3624_v22 = vld [vmem:[%s5106_s5 + $0x2c] ss:$16 sps:$4 sm:$0xff]   ;;  %v3627_v23 = vld [vmem:[%s5106_s5 + $0x44] ss:$16 sps:$4 sm:$0xff]   ;;  %2600 = vmatprep.subr.bf16.mxu0 %v3621_v19 }
 0x102   : > { %1287 = vmatprep.subr.bf16.mxu1 %v3579_v48  ;;  %v3630_v24 = vld [vmem:[%s5106_s5 + $0x4c] ss:$16 sps:$4 sm:$0xff]   ;;  %v3628_v26 = vld [vmem:[%s5106_s5 + $0x48] ss:$16 sps:$4 sm:$0xff]   ;;  %v3633_v27 = vld [vmem:[%s5106_s5 + $0x64] ss:$16 sps:$4 sm:$0xff]  }
 0x103   : > { %v3636_v28 = vld [vmem:[%s5106_s5 + $0x6c] ss:$16 sps:$4 sm:$0xff]   ;;  %v3631_v29 = vld [vmem:[%s5106_s5 + $0x60] ss:$16 sps:$4 sm:$0xff]   ;;  %v3634_v30 = vld [vmem:[%s5106_s5 + $0x68] ss:$16 sps:$4 sm:$0xff]  }
 0x104   : > { %2601 = vmatpush1.bf16.msra.mxu0 %v3619_v16  ;;  %v3639_v31 = vld [vmem:[%s5106_s5 + $0x84] ss:$16 sps:$4 sm:$0xff]   ;;  %v3642_v33 = vld [vmem:[%s5106_s5 + $0x8c] ss:$16 sps:$4 sm:$0xff]   ;;  %v3637_v34 = vld [vmem:[%s5106_s5 + $0x80] ss:$16 sps:$4 sm:$0xff]  }
 0x105   : > { %1288 = vmatpush1.bf16.msra.mxu1 %v3577_v49  ;;  %2602 = vmatprep.subr.bf16.mxu0 %v3627_v23  ;;  %v3640_v35 = vld [vmem:[%s5106_s5 + $0x88] ss:$16 sps:$4 sm:$0xff]   ;;  %v3645_v36 = vld [vmem:[%s5106_s5 + $0xa4] ss:$16 sps:$4 sm:$0xff]   ;;  %v3648_v37 = vld [vmem:[%s5106_s5 + $0xac] ss:$16 sps:$4 sm:$0xff]  }
 0x106   : > { %1289 = vmatprep.subr.bf16.mxu1 %v3582_v50  ;;  %v3643_v38 = vld [vmem:[%s5106_s5 + $0xa0] ss:$16 sps:$4 sm:$0xff]   ;;  %v3646_v40 = vld [vmem:[%s5106_s5 + $0xa8] ss:$16 sps:$4 sm:$0xff]   ;;  %v3651_v41 = vld [vmem:[%s5106_s5 + $0xc4] ss:$16 sps:$4 sm:$0xff]  }
 0x107   : > { %v3654_v42 = vld [vmem:[%s5106_s5 + $0xcc] ss:$16 sps:$4 sm:$0xff]   ;;  %v3649_v43 = vld [vmem:[%s5106_s5 + $0xc0] ss:$16 sps:$4 sm:$0xff]   ;;  %v3652_v44 = vld [vmem:[%s5106_s5 + $0xc8] ss:$16 sps:$4 sm:$0xff]  }
 0x108   : > { %v3657_v45 = vld [vmem:[%s5106_s5 + $0xe4] ss:$16 sps:$4 sm:$0xff]   ;;  %v3658_v48 = vld [vmem:[%s5106_s5 + $0xe8] ss:$16 sps:$4 sm:$0xff]   ;;  %v3666_v50 = vld [vmem:[%s5106_s5 + $0x10c] ss:$16 sps:$4 sm:$0xff]  }
 0x109   : > { %1290 = vmatpush1.bf16.msra.mxu1 %v3580_v51  ;;  %v3663_v49 = vld [vmem:[%s5106_s5 + $0x104] ss:$16 sps:$4 sm:$0xff]   ;;  %v3661_v51 = vld [vmem:[%s5106_s5 + $0x100] ss:$16 sps:$4 sm:$0xff]   ;;  %v3694_v10 = vld [vmem:[%s5106_s5 + $0x1a8] ss:$16 sps:$4 sm:$0xff]  }
 0x10a   : > { %1291 = vmatprep.subr.bf16.mxu1 %v3585_v52  ;;  %v3664_v52 = vld [vmem:[%s5106_s5 + $0x108] ss:$16 sps:$4 sm:$0xff]   ;;  %v3693_v7 = vld [vmem:[%s5106_s5 + $0x1a4] ss:$16 sps:$4 sm:$0xff]   ;;  %v3708_v16 = vld [vmem:[%s5106_s5 + $0x1ec] ss:$16 sps:$4 sm:$0xff]  }
 0x10b   : > { %v3700_v56 = vld [vmem:[%s5106_s5 + $0x1c8] ss:$16 sps:$4 sm:$0xff]   ;;  %v3703_v19 = vld [vmem:[%s5106_s5 + $0x1e0] ss:$16 sps:$4 sm:$0xff]   ;;  %v3714_v23 = vld [vmem:[%s5106_s5 + $0x20c] ss:$16 sps:$4 sm:$0xff]  }
 0x10d   : > { %1292 = vmatpush1.bf16.msra.mxu1 %v3583_v53  ;;  %v3669_v53 = vld [vmem:[%s5106_s5 + $0x124] ss:$16 sps:$4 sm:$0xff]  }
 0x10e   : > { %1293 = vmatprep.subr.bf16.mxu1 %v3588_v54  ;;  %v3672_v54 = vld [vmem:[%s5106_s5 + $0x12c] ss:$16 sps:$4 sm:$0xff]  }
 0x111   : > { %1294 = vmatpush1.bf16.msra.mxu1 %v3586_v55  ;;  %v3667_v55 = vld [vmem:[%s5106_s5 + $0x120] ss:$16 sps:$4 sm:$0xff]  }
 0x112   : > { %1295 = vmatprep.subr.bf16.mxu1 %v3591_v57  ;;  %v3670_v57 = vld [vmem:[%s5106_s5 + $0x128] ss:$16 sps:$4 sm:$0xff]  }
 0x115   : > { %1296 = vmatpush1.bf16.msra.mxu1 %v3589_v58  ;;  %v3675_v58 = vld [vmem:[%s5106_s5 + $0x144] ss:$16 sps:$4 sm:$0xff]  }
 0x116   : > { %1297 = vmatprep.subr.bf16.mxu1 %v3594_v59  ;;  %v3678_v59 = vld [vmem:[%s5106_s5 + $0x14c] ss:$16 sps:$4 sm:$0xff]  }
 0x119   : > { %1298 = vmatpush1.bf16.msra.mxu1 %v3592_v60  ;;  %v3673_v60 = vld [vmem:[%s5106_s5 + $0x140] ss:$16 sps:$4 sm:$0xff]  }
 0x11a   : > { %1299 = vmatprep.subr.bf16.mxu1 %v3597_v61  ;;  %v3676_v61 = vld [vmem:[%s5106_s5 + $0x148] ss:$16 sps:$4 sm:$0xff]  }
 0x11d   : > { %1300 = vmatpush1.bf16.msra.mxu1 %v3595_v62  ;;  %v3681_v62 = vld [vmem:[%s5106_s5 + $0x164] ss:$16 sps:$4 sm:$0xff]  }
 0x11e   : > { %1301 = vmatprep.subr.bf16.mxu1 %v3600_v63  ;;  %v3684_v63 = vld [vmem:[%s5106_s5 + $0x16c] ss:$16 sps:$4 sm:$0xff]  }
 0x121   : > { %1302 = vmatpush1.bf16.msra.mxu1 %v3598_v1  ;;  %v3679_v1 = vld [vmem:[%s5106_s5 + $0x160] ss:$16 sps:$4 sm:$0xff]  }
 0x122   : > { %1303 = vmatprep.subr.bf16.mxu1 %v3603_v2  ;;  %v3682_v2 = vld [vmem:[%s5106_s5 + $0x168] ss:$16 sps:$4 sm:$0xff]  }
 0x125   : > { %1304 = vmatpush1.bf16.msra.mxu1 %v3601_v3  ;;  %v3687_v3 = vld [vmem:[%s5106_s5 + $0x184] ss:$16 sps:$4 sm:$0xff]  }
 0x126   : > { %1305 = vmatprep.subr.bf16.mxu1 %v3606_v4  ;;  %v3690_v4 = vld [vmem:[%s5106_s5 + $0x18c] ss:$16 sps:$4 sm:$0xff]  }
 0x129   : > { %1306 = vmatpush1.bf16.msra.mxu1 %v3604_v5  ;;  %v3685_v5 = vld [vmem:[%s5106_s5 + $0x180] ss:$16 sps:$4 sm:$0xff]  }
 0x12a   : > { %1307 = vmatprep.subr.bf16.mxu1 %v3609_v6  ;;  %v3688_v6 = vld [vmem:[%s5106_s5 + $0x188] ss:$16 sps:$4 sm:$0xff]  }
 0x12d   : > { %1308 = vmatpush1.bf16.msra.mxu1 %v3607_v8  ;;  %v3696_v8 = vld [vmem:[%s5106_s5 + $0x1ac] ss:$16 sps:$4 sm:$0xff]  }
 0x12e   : > { %1309 = vmatprep.subr.bf16.mxu1 %v3612_v9  ;;  %v3691_v9 = vld [vmem:[%s5106_s5 + $0x1a0] ss:$16 sps:$4 sm:$0xff]  }
 0x131   : > { %1310 = vmatpush1.bf16.msra.mxu1 %v3610_v11  ;;  %v3699_v11 = vld [vmem:[%s5106_s5 + $0x1c4] ss:$16 sps:$4 sm:$0xff]  }
 0x132   : > { %2757 = vmatprep.subr.bf16.mxu1 %v3618_v14  ;;  %v3697_v14 = vld [vmem:[%s5106_s5 + $0x1c0] ss:$16 sps:$4 sm:$0xff]  }
 0x134   : > { %3124 = vmatmul.mubr.msk.bf16.vlgmr.msra.gmra.mrb[0].mxu1 %vm4276_vm8, %v3123_v25  ;;  %v3625_v25 = vld [vmem:[%s5106_s5 + $0x40] ss:$16 sps:$4 sm:$0xff]  }
 0x135   : > { %3127 = vmatprep.mubr.msk.bf16.mxu1 %vm4390_vm11, %v3126_v46  ;;  %2758 = vmatpush1.bf16.msra.mxu1 %v3616_v15  ;;  %v3660_v46 = vld [vmem:[%s5106_s5 + $0xec] ss:$16 sps:$4 sm:$0xff]   ;;  %v3705_v15 = vld [vmem:[%s5106_s5 + $0x1e4] ss:$16 sps:$4 sm:$0xff]  }
 0x136   : > { %2759 = vmatprep.subr.bf16.mxu1 %v3624_v22  ;;  %2603 = vmatpush1.bf16.msra.mxu0 %v3625_v25  ;;  %v3711_v22 = vld [vmem:[%s5106_s5 + $0x204] ss:$16 sps:$4 sm:$0xff]  }
 0x137   : > { %2604 = vmatprep.subr.bf16.mxu0 %v3633_v27 }
 0x139   : > { %2760 = vmatpush1.bf16.msra.mxu1 %v3622_v21  ;;  %v3706_v21 = vld [vmem:[%s5106_s5 + $0x1e8] ss:$16 sps:$4 sm:$0xff]  }
 0x13a   : > { %2761 = vmatprep.subr.bf16.mxu1 %v3630_v24  ;;  %2605 = vmatpush1.bf16.msra.mxu0 %v3631_v29 }
 0x13b   : > { %2606 = vmatprep.subr.bf16.mxu0 %v3639_v31 }
 0x13c   : > { %3130 = vmatmul.mubr.msk.bf16.gmra.mrb[4].mxu1 %vm4390_vm11, %v3129_v47  ;;  %v3655_v47 = vld [vmem:[%s5106_s5 + $0xe0] ss:$16 sps:$4 sm:$0xff]  }
 0x13d   : > { %2762 = vmatpush1.bf16.msra.mxu1 %v3628_v26 }
 0x13e   : > { %2763 = vmatprep.subr.bf16.mxu1 %v3636_v28  ;;  %2607 = vmatpush1.bf16.msra.mxu0 %v3637_v34 }
 0x13f   : > { %2608 = vmatprep.subr.bf16.mxu0 %v3645_v36 }
 0x141   : > { %2764 = vmatpush1.bf16.msra.mxu1 %v3634_v30 }
 0x142   : > { %2765 = vmatprep.subr.bf16.mxu1 %v3642_v33  ;;  %2609 = vmatpush1.bf16.msra.mxu0 %v3643_v38  ;;  %v681_v33 = vld [vmem:[%s5105_s4] sm:$0x3] }
 0x143   : > { %2610 = vmatprep.subr.bf16.mxu0 %v3651_v41  ;;  %v686_v34 = vrot.slane %v681_v33, %v4195_v18 }
 0x145   : > { %2766 = vmatpush1.bf16.msra.mxu1 %v3640_v35  ;;  %v690_v35 = vrot.slane %v681_v33, %v4201_v20 }
 0x146   : > { %2767 = vmatprep.subr.bf16.mxu1 %v3648_v37  ;;  %2611 = vmatpush1.bf16.msra.mxu0 %v3649_v43 }
 0x147   : > { %2612 = vmatprep.subr.bf16.mxu0 %v3657_v45 }
 0x149   : > { %2768 = vmatpush1.bf16.msra.mxu1 %v3646_v40 }
 0x14a   : > { %2769 = vmatprep.subr.bf16.mxu1 %v3654_v42  ;;  %2613 = vmatpush1.bf16.msra.mxu0 %v3655_v47 }
 0x14b   : > { %2614 = vmatprep.subr.bf16.mxu0 %v3663_v49 }
 0x14d   : > { %2770 = vmatpush1.bf16.msra.mxu1 %v3652_v44 }
 0x14e   : > { %2771 = vmatprep.subr.bf16.mxu1 %v3660_v46  ;;  %2615 = vmatpush1.bf16.msra.mxu0 %v3661_v51 }
 0x14f   : > { %2616 = vmatprep.subr.bf16.mxu0 %v3669_v53 }
 0x151   : > { %2772 = vmatpush1.bf16.msra.mxu1 %v3658_v48 }
 0x152   : > { %2773 = vmatprep.subr.bf16.mxu1 %v3666_v50  ;;  %2617 = vmatpush1.bf16.msra.mxu0 %v3667_v55 }
 0x153   : > { %2618 = vmatprep.subr.bf16.mxu0 %v3675_v58 }
 0x155   : > { %2774 = vmatpush1.bf16.msra.mxu1 %v3664_v52 }
 0x156   : > { %2775 = vmatprep.subr.bf16.mxu1 %v3672_v54  ;;  %2619 = vmatpush1.bf16.msra.mxu0 %v3673_v60 }
 0x157   : > { %2620 = vmatprep.subr.bf16.mxu0 %v3681_v62 }
 0x159   : > { %2776 = vmatpush1.bf16.msra.mxu1 %v3670_v57 }
 0x15a   : > { %2777 = vmatprep.subr.bf16.mxu1 %v3678_v59  ;;  %2621 = vmatpush1.bf16.msra.mxu0 %v3679_v1 }
 0x15b   : > { %2622 = vmatprep.subr.bf16.mxu0 %v3687_v3 }
 0x15d   : > { %2778 = vmatpush1.bf16.msra.mxu1 %v3676_v61 }
 0x15e   : > { %2779 = vmatprep.subr.bf16.mxu1 %v3684_v63  ;;  %2623 = vmatpush1.bf16.msra.mxu0 %v3685_v5 }
 0x15f   : > { %2624 = vmatprep.subr.bf16.mxu0 %v3693_v7 }
 0x161   : > { %2780 = vmatpush1.bf16.msra.mxu1 %v3682_v2 }
 0x162   : > { %2781 = vmatprep.subr.bf16.mxu1 %v3690_v4  ;;  %2625 = vmatpush1.bf16.msra.mxu0 %v3691_v9 }
 0x163   : > { %2626 = vmatprep.subr.bf16.mxu0 %v3699_v11 }
 0x165   : > { %2782 = vmatpush1.bf16.msra.mxu1 %v3688_v6 }
 0x166   : > { %2783 = vmatprep.subr.bf16.mxu1 %v3696_v8  ;;  %2627 = vmatpush1.bf16.msra.mxu0 %v3697_v14 }
 0x167   : > { %2628 = vmatprep.subr.bf16.mxu0 %v3705_v15 }
 0x169   : > { %2784 = vmatpush1.bf16.msra.mxu1 %v3694_v10 }
 0x16a   : > { %2785 = vmatprep.subr.bf16.mxu1 %v3702_v13  ;;  %2629 = vmatpush1.bf16.msra.mxu0 %v3703_v19 }
 0x16b   : > { %2651 = vmatprep.subr.bf16.mxu0 %v3711_v22 }
 0x16d   : > { %2786 = vmatpush1.bf16.msra.mxu1 %v3700_v56 }
 0x16e   : > { %2787 = vmatprep.subr.bf16.mxu1 %v3708_v16 }
 0x171   : > { %2788 = vmatpush1.bf16.msra.mxu1 %v3706_v21 }
 0x172   : > { %2810 = vmatprep.subr.bf16.mxu1 %v3714_v23 }
 0x1ca   : > { %v1207_v24 = vpop.f32.mrb[8].mxu0 }
 0x1cb   : > { %v1209_v25 = vpop.f32.mrb[9].mxu0  ;;  %v1208_v36 = vadd.f32 %v1207_v24, %v686_v34  ;;  %v3709_v24 = vld [vmem:[%s5106_s5 + $0x200] ss:$16 sps:$4 sm:$0xff]  }
 0x1cc   : > { %v1211_v26 = vpop.f32.mrb[10].mxu0  ;;  %v1210_v37 = vadd.f32 %v1209_v25, %v690_v35  ;;  %v3712_v25 = vld [vmem:[%s5106_s5 + $0x208] ss:$16 sps:$4 sm:$0xff]  }
 0x1cd   : > { %v1213_v27 = vpop.f32.mrb[11].mxu0  ;;  %v1212_v40 = vadd.f32 %v1211_v26, %v686_v34 }
 0x1ce   : > { %v1214_v43 = vadd.f32 %v1213_v27, %v690_v35 }
 0x1d2   : > { %v1217_v28 = vpop.f32.mrb[12].mxu0 }
 0x1d3   : > { %v1219_v29 = vpop.f32.mrb[13].mxu0  ;;  %v1218_v49 = vadd.f32 %v1217_v28, %v686_v34  ;;  %v3717_v28 = vld [vmem:[%s5106_s5 + $0x224] ss:$16 sps:$4 sm:$0xff]  }
 0x1d4   : > { %v1221_v30 = vpop.f32.mrb[14].mxu0  ;;  %v1220_v52 = vadd.f32 %v1219_v29, %v690_v35  ;;  %v3720_v29 = vld [vmem:[%s5106_s5 + $0x22c] ss:$16 sps:$4 sm:$0xff]  }
 0x1d5   : > { %v1223_v31 = vpop.f32.mrb[15].mxu0  ;;  %v1222_v53 = vadd.f32 %v1221_v30, %v686_v34 }
 0x1d6   : > { %v1224_v57 = vadd.f32 %v1223_v31, %v690_v35 }
 0x207   : > { %v1313_v38 = vpop.f32.mrb[0].mxu1 }
 0x208   : > { %v3376_v41 = vadd.f32 %v1313_v38, %v1208_v36  ;;  %v1315_v42 = vpop.f32.mrb[1].mxu1 }
 0x209   : > { %v3378_v44 = vadd.f32 %v1315_v42, %v1210_v37  ;;  %v1317_v45 = vpop.f32.mrb[2].mxu1  ;;  %v3718_v42 = vld [vmem:[%s5106_s5 + $0x228] ss:$16 sps:$4 sm:$0xff]  }
 0x20a   : > { %v1332_v46 = vmax.f32 %v3376_v41, 0.0  ;;  %v3380_v47 = vadd.f32 %v1317_v45, %v1212_v40  ;;  %v1319_v48 = vpop.f32.mrb[3].mxu1  ;;  %v3715_v41 = vld [vmem:[%s5106_s5 + $0x220] ss:$16 sps:$4 sm:$0xff]  }
 0x20b   : > { %v1333_v50 = vmax.f32 %v3378_v44, 0.0  ;;  %v3382_v51 = vadd.f32 %v1319_v48, %v1214_v43  ;;  %v3726_v48 = vld [vmem:[%s5106_s5 + $0x24c] ss:$16 sps:$4 sm:$0xff]  }
 0x20c   : > { %v1348_v54 = vrot.slane %v1332_v46, 7  ;;  %v1334_v55 = vmax.f32 %v3380_v47, 0.0  ;;  %v1380_v58 = vrot.slane %v1332_v46, 1  ;;  %v3723_v47 = vld [vmem:[%s5106_s5 + $0x244] ss:$16 sps:$4 sm:$0xff]  }
 0x20d   : > { %v1349_v59 = vrot.slane %v1333_v50, 7  ;;  %v4606_v60 = vmax.f32 %v3382_v51, 0.0  ;;  %v1383_v61 = vrot.slane %v1333_v50, 1 }
 0x20e   : > { %v1350_v62 = vrot.slane %v1334_v55, 7  ;;  %v1381_v63 = vrot.slane %v1334_v55, 1  ;;  %v4608_v1 = vpack.c.bf16 %v1334_v55, %v1332_v46  ;;  %v1370_v2 = vsel %vm491_vm1, 0.0, %v1348_v54 }
 0x20f   : > { %v1352_v3 = vrot.slane %v4606_v60, 7  ;;  %v1384_v4 = vrot.slane %v4606_v60, 1  ;;  %v1323_v5 = vpop.f32.mrb[4].mxu1  ;;  %v4614_v6 = vpack.c.bf16 %v4606_v60, %v1333_v50  ;;  %v1371_v7 = vsel %vm491_vm1, 0.0, %v1349_v59  ;;  %v3724_v60 = vld [vmem:[%s5106_s5 + $0x248] ss:$16 sps:$4 sm:$0xff]  }
 0x210   : > { %v1351_v8 = vsel %vm491_vm1, %v1348_v54, %v1350_v62  ;;  %v1382_v9 = vsel %vm532_vm2, %v1380_v58, %v1381_v63  ;;  %v3384_v10 = vadd.f32 %v1323_v5, %v1218_v49  ;;  %v1325_v11 = vpop.f32.mrb[5].mxu1 }
 0x211   : > { %v3327_v13 = vpack.c.bf16 %v1351_v8, %v1370_v2  ;;  %v3386_v14 = vadd.f32 %v1325_v11, %v1220_v52  ;;  %v1327_v56 = vpop.f32.mrb[6].mxu1  ;;  %v1353_v15 = vsel %vm491_vm1, %v1349_v59, %v1352_v3  ;;  %v1385_v16 = vsel %vm532_vm2, %v1383_v61, %v1384_v4  ;;  %v3721_v59 = vld [vmem:[%s5106_s5 + $0x240] ss:$16 sps:$4 sm:$0xff]   ;;  %v3730_v8 = vld [vmem:[%s5106_s5 + $0x268] ss:$16 sps:$4 sm:$0xff]  }
 0x212   : > { %v1336_v19 = vmax.f32 %v3384_v10, 0.0  ;;  %v3388_v21 = vadd.f32 %v1327_v56, %v1222_v53  ;;  %v1329_v22 = vpop.f32.mrb[7].mxu1  ;;  %v3324_v23 = vpack.c.bf16 %v1353_v15, %v1371_v7  ;;  %v3727_v7 = vld [vmem:[%s5106_s5 + $0x260] ss:$16 sps:$4 sm:$0xff]   ;;  %v3741_v11 = vld [vmem:[%s5106_s5 + $0x2a4] ss:$16 sps:$4 sm:$0xff]  }
 0x213   : > { %v1337_v26 = vmax.f32 %v3386_v14, 0.0  ;;  %v3390_v27 = vadd.f32 %v1329_v22, %v1224_v57  ;;  %v3733_v10 = vld [vmem:[%s5106_s5 + $0x280] ss:$16 sps:$4 sm:$0xff]   ;;  %v3742_v56 = vld [vmem:[%s5106_s5 + $0x2a8] ss:$16 sps:$4 sm:$0xff]  }
 0x214   : > { %v1354_v30 = vrot.slane %v1336_v19, 7  ;;  %v1386_v31 = vrot.slane %v1336_v19, 1  ;;  %v1338_v33 = vmax.f32 %v3388_v21, 0.0  ;;  %3325 = vmatprep.mubr.msk.bf16.mxu0 %vm4238_vm5, %v3324_v23  ;;  %3349 = vmatprep.mubr.msk.bf16.mxu1 %vm4238_vm5, %v3324_v23  ;;  %v3739_v14 = vld [vmem:[%s5106_s5 + $0x2a0] ss:$16 sps:$4 sm:$0xff]  }
 0x215   : > { %v1356_v34 = vrot.slane %v1337_v26, 7  ;;  %v1388_v35 = vrot.slane %v1337_v26, 1  ;;  %v1339_v36 = vmax.f32 %v3390_v27, 0.0  ;;  %3328 = vmatmul.mubr.msk.bf16.vlgmr.msra.gmra.mrb[16].mxu0 %vm4238_vm5, %v3327_v13  ;;  %3352 = vmatmul.mubr.msk.bf16.vlgmr.msra.gmra.mrb[8].mxu1 %vm4238_vm5, %v3327_v13  ;;  %v3744_v13 = vld [vmem:[%s5106_s5 + $0x2ac] ss:$16 sps:$4 sm:$0xff]  }
 0x216   : > { %v1387_v37 = vsel %vm532_vm2, %v1381_v63, %v1386_v31  ;;  %v1358_v38 = vrot.slane %v1338_v33, 7  ;;  %v1390_v40 = vrot.slane %v1338_v33, 1  ;;  %2652 = vmatpush1.bf16.msra.mxu0 %v3709_v24  ;;  %2811 = vmatpush1.bf16.msra.mxu1 %v3712_v25  ;;  %v1355_v43 = vsel %vm491_vm1, %v1350_v62, %v1354_v30  ;;  %v3747_v15 = vld [vmem:[%s5106_s5 + $0x2c4] ss:$16 sps:$4 sm:$0xff]   ;;  %v3748_v21 = vld [vmem:[%s5106_s5 + $0x2c8] ss:$16 sps:$4 sm:$0xff]  }
 0x217   : > { %v4649_v44 = vpack.c.bf16 %v1387_v37, %v1382_v9  ;;  %v1360_v0 = vrot.slane %v1339_v36, 7  ;;  %v1392_v45 = vrot.slane %v1339_v36, 1  ;;  %2653 = vmatprep.subr.bf16.mxu0 %v3717_v28  ;;  %2812 = vmatprep.subr.bf16.mxu1 %v3720_v29  ;;  %v1357_v46 = vsel %vm491_vm1, %v1352_v3, %v1356_v34  ;;  %v3729_v3 = vld [vmem:[%s5106_s5 + $0x264] ss:$16 sps:$4 sm:$0xff]   ;;  %v3756_v23 = vld [vmem:[%s5106_s5 + $0x2ec] ss:$16 sps:$4 sm:$0xff]  }
 0x218   : > { %v1402_v49 = vsel %vm532_vm2, %v1390_v40, 0.0  ;;  %v1359_v50 = vsel %vm491_vm1, %v1354_v30, %v1358_v38  ;;  %v4660_v51 = vpack.c.bf16 %v1339_v36, %v1337_v26  ;;  %v4662_v52 = vpack.c.bf16 %v1338_v33, %v1336_v19  ;;  %v3735_v9 = vld [vmem:[%s5106_s5 + $0x284] ss:$16 sps:$4 sm:$0xff]   ;;  %v3745_v19 = vld [vmem:[%s5106_s5 + $0x2c0] ss:$16 sps:$4 sm:$0xff]  }
 0x219   : > { %v1403_v53 = vsel %vm532_vm2, %v1392_v45, 0.0  ;;  %v1361_v54 = vsel %vm491_vm1, %v1356_v34, %v1360_v0  ;;  %v3333_v55 = vpack.c.bf16 %v1359_v50, %v1355_v43  ;;  %v1389_v57 = vsel %vm532_vm2, %v1384_v4, %v1388_v35  ;;  %v3732_v4 = vld [vmem:[%s5106_s5 + $0x26c] ss:$16 sps:$4 sm:$0xff]   ;;  %v3753_v22 = vld [vmem:[%s5106_s5 + $0x2e4] ss:$16 sps:$4 sm:$0xff]  }
 0x21a   : > { %2654 = vmatpush1.bf16.msra.mxu0 %v3715_v41  ;;  %2813 = vmatpush1.bf16.msra.mxu1 %v3718_v42  ;;  %v3330_v58 = vpack.c.bf16 %v1361_v54, %v1357_v46  ;;  %v4673_v61 = vpack.c.bf16 %v1389_v57, %v1385_v16  ;;  %v1393_v62 = vsel %vm532_vm2, %v1388_v35, %v1392_v45  ;;  %v3750_v16 = vld [vmem:[%s5106_s5 + $0x2cc] ss:$16 sps:$4 sm:$0xff]   ;;  %v3751_v24 = vld [vmem:[%s5106_s5 + $0x2e0] ss:$16 sps:$4 sm:$0xff]   ;;  %v3754_v25 = vld [vmem:[%s5106_s5 + $0x2e8] ss:$16 sps:$4 sm:$0xff]  }
 0x21b   : > { %2655 = vmatprep.subr.bf16.mxu0 %v3723_v47  ;;  %2814 = vmatprep.subr.bf16.mxu1 %v3726_v48  ;;  %v4676_v63 = vpack.c.bf16 %v1403_v53, %v1393_v62  ;;  %v1391_v2 = vsel %vm532_vm2, %v1386_v31, %v1390_v40  ;;  %v3759_v26 = vld [vmem:[%s5106_s5 + $0x304] ss:$16 sps:$4 sm:$0xff]   ;;  %v3762_v27 = vld [vmem:[%s5106_s5 + $0x30c] ss:$16 sps:$4 sm:$0xff]   ;;  %v3757_v28 = vld [vmem:[%s5106_s5 + $0x300] ss:$16 sps:$4 sm:$0xff]  }
 0x21c   : > { %3331 = vmatprep.mubr.msk.bf16.mxu0 %vm4292_vm9, %v3330_v58  ;;  %3355 = vmatprep.mubr.msk.bf16.mxu1 %vm4292_vm9, %v3330_v58  ;;  %v4689_v5 = vpack.c.bf16 %v1402_v49, %v1391_v2  ;;  %v3760_v29 = vld [vmem:[%s5106_s5 + $0x308] ss:$16 sps:$4 sm:$0xff]   ;;  %v3765_v30 = vld [vmem:[%s5106_s5 + $0x324] ss:$16 sps:$4 sm:$0xff]   ;;  %v3768_v31 = vld [vmem:[%s5106_s5 + $0x32c] ss:$16 sps:$4 sm:$0xff]  }
 0x21d   : > { %3334 = vmatmul.mubr.msk.bf16.gmra.mrb[20].mxu0 %vm4292_vm9, %v3333_v55  ;;  %3358 = vmatmul.mubr.msk.bf16.gmra.mrb[12].mxu1 %vm4292_vm9, %v3333_v55  ;;  %v3763_v33 = vld [vmem:[%s5106_s5 + $0x320] ss:$16 sps:$4 sm:$0xff]   ;;  %v3766_v34 = vld [vmem:[%s5106_s5 + $0x328] ss:$16 sps:$4 sm:$0xff]   ;;  %v3771_v35 = vld [vmem:[%s5106_s5 + $0x344] ss:$16 sps:$4 sm:$0xff]  }
 0x21e   : > { %2656 = vmatpush1.bf16.msra.mxu0 %v3721_v59  ;;  %2815 = vmatpush1.bf16.msra.mxu1 %v3724_v60  ;;  %v3774_v36 = vld [vmem:[%s5106_s5 + $0x34c] ss:$16 sps:$4 sm:$0xff]   ;;  %v3769_v37 = vld [vmem:[%s5106_s5 + $0x340] ss:$16 sps:$4 sm:$0xff]   ;;  %v3772_v38 = vld [vmem:[%s5106_s5 + $0x348] ss:$16 sps:$4 sm:$0xff]  }
 0x21f   : > { %2683 = vmatprep.mubr.bf16.mxu0 %v4614_v6  ;;  %2842 = vmatprep.mubr.bf16.mxu1 %v4614_v6  ;;  %v3736_v6 = vld [vmem:[%s5106_s5 + $0x288] ss:$16 sps:$4 sm:$0xff]   ;;  %v3777_v40 = vld [vmem:[%s5106_s5 + $0x364] ss:$16 sps:$4 sm:$0xff]   ;;  %v3780_v41 = vld [vmem:[%s5106_s5 + $0x36c] ss:$16 sps:$4 sm:$0xff]  }
 0x220   : > { %2657 = vmatprep.subr.bf16.mxu0 %v3729_v3  ;;  %2816 = vmatprep.subr.bf16.mxu1 %v3732_v4  ;;  %v3775_v42 = vld [vmem:[%s5106_s5 + $0x360] ss:$16 sps:$4 sm:$0xff]   ;;  %v3778_v43 = vld [vmem:[%s5106_s5 + $0x368] ss:$16 sps:$4 sm:$0xff]   ;;  %v3783_v0 = vld [vmem:[%s5106_s5 + $0x384] ss:$16 sps:$4 sm:$0xff]  }
 0x221   : > { %v3786_v45 = vld [vmem:[%s5106_s5 + $0x38c] ss:$16 sps:$4 sm:$0xff]   ;;  %v3781_v46 = vld [vmem:[%s5106_s5 + $0x380] ss:$16 sps:$4 sm:$0xff]   ;;  %v3784_v47 = vld [vmem:[%s5106_s5 + $0x388] ss:$16 sps:$4 sm:$0xff]  }
 0x222   : > { %2658 = vmatpush1.bf16.msra.mxu0 %v3727_v7  ;;  %2817 = vmatpush1.bf16.msra.mxu1 %v3730_v8  ;;  %v3789_v48 = vld [vmem:[%s5106_s5 + $0x3a4] ss:$16 sps:$4 sm:$0xff]   ;;  %v3792_v49 = vld [vmem:[%s5106_s5 + $0x3ac] ss:$16 sps:$4 sm:$0xff]   ;;  %v3787_v50 = vld [vmem:[%s5106_s5 + $0x3a0] ss:$16 sps:$4 sm:$0xff]  }
 0x223   : > { %2659 = vmatprep.subr.bf16.mxu0 %v3735_v9  ;;  %2818 = vmatprep.subr.bf16.mxu1 %v3738_v39  ;;  %v3790_v53 = vld [vmem:[%s5106_s5 + $0x3a8] ss:$16 sps:$4 sm:$0xff]   ;;  %v3795_v54 = vld [vmem:[%s5106_s5 + $0x3c4] ss:$16 sps:$4 sm:$0xff]   ;;  %v3798_v55 = vld [vmem:[%s5106_s5 + $0x3cc] ss:$16 sps:$4 sm:$0xff]  }
 0x224   : > { %v3793_v57 = vld [vmem:[%s5106_s5 + $0x3c0] ss:$16 sps:$4 sm:$0xff]   ;;  %v3796_v58 = vld [vmem:[%s5106_s5 + $0x3c8] ss:$16 sps:$4 sm:$0xff]   ;;  %v3801_v59 = vld [vmem:[%s5106_s5 + $0x3e4] ss:$16 sps:$4 sm:$0xff]  }
 0x225   : > { %v3804_v60 = vld [vmem:[%s5106_s5 + $0x3ec] ss:$16 sps:$4 sm:$0xff]   ;;  %v3799_v62 = vld [vmem:[%s5106_s5 + $0x3e0] ss:$16 sps:$4 sm:$0xff]   ;;  %v3802_v2 = vld [vmem:[%s5106_s5 + $0x3e8] ss:$16 sps:$4 sm:$0xff]  }
 0x226   : > { %2660 = vmatpush1.bf16.msra.mxu0 %v3733_v10  ;;  %2819 = vmatpush1.bf16.msra.mxu1 %v3736_v6  ;;  %v3807_v3 = vld [vmem:[%s5106_s5 + $0x404] ss:$16 sps:$4 sm:$0xff]   ;;  %v3810_v4 = vld [vmem:[%s5106_s5 + $0x40c] ss:$16 sps:$4 sm:$0xff]   ;;  %v3805_v7 = vld [vmem:[%s5106_s5 + $0x400] ss:$16 sps:$4 sm:$0xff]  }
 0x227   : > { %2661 = vmatprep.subr.bf16.mxu0 %v3741_v11  ;;  %2820 = vmatprep.subr.bf16.mxu1 %v3744_v13  ;;  %v3808_v8 = vld [vmem:[%s5106_s5 + $0x408] ss:$16 sps:$4 sm:$0xff]   ;;  %v3813_v9 = vld [vmem:[%s5106_s5 + $0x424] ss:$16 sps:$4 sm:$0xff]   ;;  %v3816_v39 = vld [vmem:[%s5106_s5 + $0x42c] ss:$16 sps:$4 sm:$0xff]  }
 0x228   : > { %v3811_v10 = vld [vmem:[%s5106_s5 + $0x420] ss:$16 sps:$4 sm:$0xff]   ;;  %v3814_v6 = vld [vmem:[%s5106_s5 + $0x428] ss:$16 sps:$4 sm:$0xff]   ;;  %v3819_v11 = vld [vmem:[%s5106_s5 + $0x444] ss:$16 sps:$4 sm:$0xff]  }
 0x229   : > { %v3820_v13 = vld [vmem:[%s5106_s5 + $0x448] ss:$16 sps:$4 sm:$0xff]  }
 0x22a   : > { %2662 = vmatpush1.bf16.msra.mxu0 %v3739_v14  ;;  %2821 = vmatpush1.bf16.msra.mxu1 %v3742_v56  ;;  %v3825_v14 = vld [vmem:[%s5106_s5 + $0x464] ss:$16 sps:$4 sm:$0xff]   ;;  %v3828_v56 = vld [vmem:[%s5106_s5 + $0x46c] ss:$16 sps:$4 sm:$0xff]  }
 0x22b   : > { %2663 = vmatprep.subr.bf16.mxu0 %v3747_v15  ;;  %2822 = vmatprep.subr.bf16.mxu1 %v3750_v16  ;;  %v3823_v15 = vld [vmem:[%s5106_s5 + $0x460] ss:$16 sps:$4 sm:$0xff]   ;;  %v3826_v16 = vld [vmem:[%s5106_s5 + $0x468] ss:$16 sps:$4 sm:$0xff]  }
 0x22e   : > { %2664 = vmatpush1.bf16.msra.mxu0 %v3745_v19  ;;  %2823 = vmatpush1.bf16.msra.mxu1 %v3748_v21  ;;  %v3834_v19 = vld [vmem:[%s5106_s5 + $0x48c] ss:$16 sps:$4 sm:$0xff]   ;;  %v3829_v21 = vld [vmem:[%s5106_s5 + $0x480] ss:$16 sps:$4 sm:$0xff]  }
 0x22f   : > { %2665 = vmatprep.subr.bf16.mxu0 %v3753_v22  ;;  %2824 = vmatprep.subr.bf16.mxu1 %v3756_v23  ;;  %v3837_v22 = vld [vmem:[%s5106_s5 + $0x4a4] ss:$16 sps:$4 sm:$0xff]   ;;  %v3840_v23 = vld [vmem:[%s5106_s5 + $0x4ac] ss:$16 sps:$4 sm:$0xff]  }
 0x232   : > { %2666 = vmatpush1.bf16.msra.mxu0 %v3751_v24  ;;  %2825 = vmatpush1.bf16.msra.mxu1 %v3754_v25  ;;  %v3835_v24 = vld [vmem:[%s5106_s5 + $0x4a0] ss:$16 sps:$4 sm:$0xff]   ;;  %v3838_v25 = vld [vmem:[%s5106_s5 + $0x4a8] ss:$16 sps:$4 sm:$0xff]  }
 0x233   : > { %2667 = vmatprep.subr.bf16.mxu0 %v3759_v26  ;;  %2826 = vmatprep.subr.bf16.mxu1 %v3762_v27  ;;  %v3843_v26 = vld [vmem:[%s5106_s5 + $0x4c4] ss:$16 sps:$4 sm:$0xff]   ;;  %v3846_v27 = vld [vmem:[%s5106_s5 + $0x4cc] ss:$16 sps:$4 sm:$0xff]  }
 0x236   : > { %2668 = vmatpush1.bf16.msra.mxu0 %v3757_v28  ;;  %2827 = vmatpush1.bf16.msra.mxu1 %v3760_v29  ;;  %v3841_v28 = vld [vmem:[%s5106_s5 + $0x4c0] ss:$16 sps:$4 sm:$0xff]   ;;  %v3844_v29 = vld [vmem:[%s5106_s5 + $0x4c8] ss:$16 sps:$4 sm:$0xff]  }
 0x237   : > { %2669 = vmatprep.subr.bf16.mxu0 %v3765_v30  ;;  %2828 = vmatprep.subr.bf16.mxu1 %v3768_v31  ;;  %v3849_v30 = vld [vmem:[%s5106_s5 + $0x4e4] ss:$16 sps:$4 sm:$0xff]   ;;  %v3852_v31 = vld [vmem:[%s5106_s5 + $0x4ec] ss:$16 sps:$4 sm:$0xff]  }
 0x23a   : > { %2670 = vmatpush1.bf16.msra.mxu0 %v3763_v33  ;;  %2829 = vmatpush1.bf16.msra.mxu1 %v3766_v34  ;;  %v3847_v33 = vld [vmem:[%s5106_s5 + $0x4e0] ss:$16 sps:$4 sm:$0xff]   ;;  %v3850_v34 = vld [vmem:[%s5106_s5 + $0x4e8] ss:$16 sps:$4 sm:$0xff]  }
 0x23b   : > { %2671 = vmatprep.subr.bf16.mxu0 %v3771_v35  ;;  %2830 = vmatprep.subr.bf16.mxu1 %v3774_v36  ;;  %v3855_v35 = vld [vmem:[%s5106_s5 + $0x504] ss:$16 sps:$4 sm:$0xff]   ;;  %v3858_v36 = vld [vmem:[%s5106_s5 + $0x50c] ss:$16 sps:$4 sm:$0xff]  }
 0x23e   : > { %2672 = vmatpush1.bf16.msra.mxu0 %v3769_v37  ;;  %2831 = vmatpush1.bf16.msra.mxu1 %v3772_v38  ;;  %v3853_v37 = vld [vmem:[%s5106_s5 + $0x500] ss:$16 sps:$4 sm:$0xff]   ;;  %v3856_v38 = vld [vmem:[%s5106_s5 + $0x508] ss:$16 sps:$4 sm:$0xff]  }
 0x23f   : > { %2673 = vmatprep.subr.bf16.mxu0 %v3777_v40  ;;  %2832 = vmatprep.subr.bf16.mxu1 %v3780_v41  ;;  %v3861_v40 = vld [vmem:[%s5106_s5 + $0x524] ss:$16 sps:$4 sm:$0xff]   ;;  %v3864_v41 = vld [vmem:[%s5106_s5 + $0x52c] ss:$16 sps:$4 sm:$0xff]  }
 0x242   : > { %2674 = vmatpush1.bf16.msra.mxu0 %v3775_v42  ;;  %2833 = vmatpush1.bf16.msra.mxu1 %v3778_v43  ;;  %v3859_v42 = vld [vmem:[%s5106_s5 + $0x520] ss:$16 sps:$4 sm:$0xff]   ;;  %v3862_v43 = vld [vmem:[%s5106_s5 + $0x528] ss:$16 sps:$4 sm:$0xff]  }
 0x243   : > { %2675 = vmatprep.subr.bf16.mxu0 %v3783_v0  ;;  %2834 = vmatprep.subr.bf16.mxu1 %v3786_v45  ;;  %v3867_v0 = vld [vmem:[%s5106_s5 + $0x544] ss:$16 sps:$4 sm:$0xff]   ;;  %v3870_v45 = vld [vmem:[%s5106_s5 + $0x54c] ss:$16 sps:$4 sm:$0xff]  }
 0x246   : > { %2676 = vmatpush1.bf16.msra.mxu0 %v3781_v46  ;;  %2835 = vmatpush1.bf16.msra.mxu1 %v3784_v47  ;;  %v3865_v46 = vld [vmem:[%s5106_s5 + $0x540] ss:$16 sps:$4 sm:$0xff]   ;;  %v3868_v47 = vld [vmem:[%s5106_s5 + $0x548] ss:$16 sps:$4 sm:$0xff]  }
 0x247   : > { %2677 = vmatprep.subr.bf16.mxu0 %v3789_v48  ;;  %2836 = vmatprep.subr.bf16.mxu1 %v3792_v49  ;;  %v3873_v48 = vld [vmem:[%s5106_s5 + $0x564] ss:$16 sps:$4 sm:$0xff]   ;;  %v3876_v49 = vld [vmem:[%s5106_s5 + $0x56c] ss:$16 sps:$4 sm:$0xff]  }
 0x24a   : > { %2678 = vmatpush1.bf16.msra.mxu0 %v3787_v50  ;;  %2837 = vmatpush1.bf16.msra.mxu1 %v3790_v53  ;;  %v3871_v50 = vld [vmem:[%s5106_s5 + $0x560] ss:$16 sps:$4 sm:$0xff]   ;;  %v3874_v53 = vld [vmem:[%s5106_s5 + $0x568] ss:$16 sps:$4 sm:$0xff]  }
 0x24b   : > { %2679 = vmatprep.subr.bf16.mxu0 %v3795_v54  ;;  %2838 = vmatprep.subr.bf16.mxu1 %v3798_v55  ;;  %v3879_v54 = vld [vmem:[%s5106_s5 + $0x584] ss:$16 sps:$4 sm:$0xff]   ;;  %v3882_v55 = vld [vmem:[%s5106_s5 + $0x58c] ss:$16 sps:$4 sm:$0xff]  }
 0x24e   : > { %2680 = vmatpush1.bf16.msra.mxu0 %v3793_v57  ;;  %2839 = vmatpush1.bf16.msra.mxu1 %v3796_v58  ;;  %v3877_v57 = vld [vmem:[%s5106_s5 + $0x580] ss:$16 sps:$4 sm:$0xff]   ;;  %v3880_v58 = vld [vmem:[%s5106_s5 + $0x588] ss:$16 sps:$4 sm:$0xff]  }
 0x24f   : > { %2681 = vmatprep.subr.bf16.mxu0 %v3801_v59  ;;  %2840 = vmatprep.subr.bf16.mxu1 %v3804_v60  ;;  %v3885_v59 = vld [vmem:[%s5106_s5 + $0x5a4] ss:$16 sps:$4 sm:$0xff]   ;;  %v3888_v60 = vld [vmem:[%s5106_s5 + $0x5ac] ss:$16 sps:$4 sm:$0xff]  }
 0x252   : > { %2682 = vmatpush1.bf16.msra.mxu0 %v3799_v62  ;;  %2841 = vmatpush1.bf16.msra.mxu1 %v3802_v2  ;;  %v3883_v62 = vld [vmem:[%s5106_s5 + $0x5a0] ss:$16 sps:$4 sm:$0xff]   ;;  %v3886_v2 = vld [vmem:[%s5106_s5 + $0x5a8] ss:$16 sps:$4 sm:$0xff]  }
 0x253   : > { %2704 = vmatprep.subr.bf16.mxu0 %v3807_v3  ;;  %2863 = vmatprep.subr.bf16.mxu1 %v3810_v4  ;;  %v3891_v3 = vld [vmem:[%s5106_s5 + $0x5c4] ss:$16 sps:$4 sm:$0xff]   ;;  %v3894_v4 = vld [vmem:[%s5106_s5 + $0x5cc] ss:$16 sps:$4 sm:$0xff]  }
 0x255   : > { %2684 = vmatmul.mubr.bf16.vlgmr.msra.gmra.mrb[16].mxu0 %v4608_v1  ;;  %2843 = vmatmul.mubr.bf16.vlgmr.msra.gmra.mrb[8].mxu1 %v4608_v1  ;;  %v3822_v1 = vld [vmem:[%s5106_s5 + $0x44c] ss:$16 sps:$4 sm:$0xff]  }
 0x256   : > { %2693 = vmatprep.mubr.bf16.mxu0 %v4660_v51  ;;  %2705 = vmatpush1.bf16.msra.mxu0 %v3805_v7  ;;  %v3889_v7 = vld [vmem:[%s5106_s5 + $0x5c0] ss:$16 sps:$4 sm:$0xff]  }
 0x257   : > { %2852 = vmatprep.mubr.bf16.mxu1 %v4660_v51  ;;  %2864 = vmatpush1.bf16.msra.mxu1 %v3808_v8  ;;  %v3817_v51 = vld [vmem:[%s5106_s5 + $0x440] ss:$16 sps:$4 sm:$0xff]   ;;  %v3892_v8 = vld [vmem:[%s5106_s5 + $0x5c8] ss:$16 sps:$4 sm:$0xff]  }
 0x258   : > { %2706 = vmatprep.subr.bf16.mxu0 %v3813_v9  ;;  %2865 = vmatprep.subr.bf16.mxu1 %v3816_v39  ;;  %v3897_v9 = vld [vmem:[%s5106_s5 + $0x5e4] ss:$16 sps:$4 sm:$0xff]   ;;  %v3900_v39 = vld [vmem:[%s5106_s5 + $0x5ec] ss:$16 sps:$4 sm:$0xff]  }
 0x25a   : > { %2707 = vmatpush1.bf16.msra.mxu0 %v3811_v10  ;;  %v3895_v10 = vld [vmem:[%s5106_s5 + $0x5e0] ss:$16 sps:$4 sm:$0xff]  }
 0x25b   : > { %2866 = vmatpush1.bf16.msra.mxu1 %v3814_v6  ;;  %2708 = vmatprep.subr.bf16.mxu0 %v3819_v11  ;;  %v3898_v6 = vld [vmem:[%s5106_s5 + $0x5e8] ss:$16 sps:$4 sm:$0xff]   ;;  %v1632_v11 = vsub.s32 3, %v4192_v17 }
 0x25c   : > { %2867 = vmatprep.subr.bf16.mxu1 %v3822_v1  ;;  %v1621_v1 = vrot.slane %v1616_v32, %v4195_v18 }
 0x25d   : > { %2694 = vmatmul.mubr.bf16.gmra.mrb[20].mxu0 %v4662_v52  ;;  %2853 = vmatmul.mubr.bf16.gmra.mrb[12].mxu1 %v4662_v52  ;;  %v3831_v52 = vld [vmem:[%s5106_s5 + $0x484] ss:$16 sps:$4 sm:$0xff]  }
 0x25e   : > { %2709 = vmatpush1.bf16.msra.mxu0 %v3817_v51  ;;  %3337 = vmatprep.mubr.msk.bf16.mxu0 %vm4276_vm8, %v4673_v61  ;;  %v1625_v51 = vrot.slane %v1616_v32, %v4201_v20 }
 0x25f   : > { %2868 = vmatpush1.bf16.msra.mxu1 %v3820_v13  ;;  %3361 = vmatprep.mubr.msk.bf16.mxu1 %vm4276_vm8, %v4673_v61  ;;  %v3832_v61 = vld [vmem:[%s5106_s5 + $0x488] ss:$16 sps:$4 sm:$0xff]   ;;  %v1633_v13 = vrot.slane %v1616_v32, %v1632_v11 }
 0x260   : > { %2710 = vmatprep.subr.bf16.mxu0 %v3825_v14  ;;  %2869 = vmatprep.subr.bf16.mxu1 %v3828_v56 }
 0x262   : > { %2711 = vmatpush1.bf16.msra.mxu0 %v3823_v15 }
 0x263   : > { %2870 = vmatpush1.bf16.msra.mxu1 %v3826_v16  ;;  %2712 = vmatprep.subr.bf16.mxu0 %v3831_v52 }
 0x264   : > { %2871 = vmatprep.subr.bf16.mxu1 %v3834_v19 }
 0x266   : > { %2713 = vmatpush1.bf16.msra.mxu0 %v3829_v21 }
 0x267   : > { %2872 = vmatpush1.bf16.msra.mxu1 %v3832_v61  ;;  %2714 = vmatprep.subr.bf16.mxu0 %v3837_v22 }
 0x268   : > { %2873 = vmatprep.subr.bf16.mxu1 %v3840_v23 }
 0x26a   : > { %2715 = vmatpush1.bf16.msra.mxu0 %v3835_v24 }
 0x26b   : > { %2874 = vmatpush1.bf16.msra.mxu1 %v3838_v25  ;;  %2716 = vmatprep.subr.bf16.mxu0 %v3843_v26 }
 0x26c   : > { %2875 = vmatprep.subr.bf16.mxu1 %v3846_v27 }
 0x26e   : > { %2717 = vmatpush1.bf16.msra.mxu0 %v3841_v28 }
 0x26f   : > { %2876 = vmatpush1.bf16.msra.mxu1 %v3844_v29  ;;  %2718 = vmatprep.subr.bf16.mxu0 %v3849_v30 }
 0x270   : > { %2877 = vmatprep.subr.bf16.mxu1 %v3852_v31 }
 0x272   : > { %2719 = vmatpush1.bf16.msra.mxu0 %v3847_v33 }
 0x273   : > { %2878 = vmatpush1.bf16.msra.mxu1 %v3850_v34  ;;  %2720 = vmatprep.subr.bf16.mxu0 %v3855_v35 }
 0x274   : > { %2879 = vmatprep.subr.bf16.mxu1 %v3858_v36 }
 0x276   : > { %2721 = vmatpush1.bf16.msra.mxu0 %v3853_v37 }
 0x277   : > { %2880 = vmatpush1.bf16.msra.mxu1 %v3856_v38  ;;  %2722 = vmatprep.subr.bf16.mxu0 %v3861_v40 }
 0x278   : > { %2881 = vmatprep.subr.bf16.mxu1 %v3864_v41 }
 0x27a   : > { %2723 = vmatpush1.bf16.msra.mxu0 %v3859_v42 }
 0x27b   : > { %2882 = vmatpush1.bf16.msra.mxu1 %v3862_v43  ;;  %2724 = vmatprep.subr.bf16.mxu0 %v3867_v0 }
 0x27c   : > { %2883 = vmatprep.subr.bf16.mxu1 %v3870_v45 }
 0x27e   : > { %2725 = vmatpush1.bf16.msra.mxu0 %v3865_v46 }
 0x27f   : > { %2884 = vmatpush1.bf16.msra.mxu1 %v3868_v47  ;;  %2726 = vmatprep.subr.bf16.mxu0 %v3873_v48 }
 0x280   : > { %2885 = vmatprep.subr.bf16.mxu1 %v3876_v49 }
 0x282   : > { %2727 = vmatpush1.bf16.msra.mxu0 %v3871_v50 }
 0x283   : > { %2886 = vmatpush1.bf16.msra.mxu1 %v3874_v53  ;;  %2728 = vmatprep.subr.bf16.mxu0 %v3879_v54 }
 0x284   : > { %2887 = vmatprep.subr.bf16.mxu1 %v3882_v55 }
 0x286   : > { %2729 = vmatpush1.bf16.msra.mxu0 %v3877_v57 }
 0x287   : > { %2888 = vmatpush1.bf16.msra.mxu1 %v3880_v58  ;;  %2730 = vmatprep.subr.bf16.mxu0 %v3885_v59 }
 0x288   : > { %2889 = vmatprep.subr.bf16.mxu1 %v3888_v60 }
 0x28a   : > { %2731 = vmatpush1.bf16.msra.mxu0 %v3883_v62 }
 0x28b   : > { %2890 = vmatpush1.bf16.msra.mxu1 %v3886_v2  ;;  %2732 = vmatprep.subr.bf16.mxu0 %v3891_v3 }
 0x28c   : > { %2891 = vmatprep.subr.bf16.mxu1 %v3894_v4 }
 0x28e   : > { %2733 = vmatpush1.bf16.msra.mxu0 %v3889_v7 }
 0x28f   : > { %2892 = vmatpush1.bf16.msra.mxu1 %v3892_v8  ;;  %2734 = vmatprep.subr.bf16.mxu0 %v3897_v9 }
 0x290   : > { %2893 = vmatprep.subr.bf16.mxu1 %v3900_v39 }
 0x292   : > { %2735 = vmatpush1.bf16.msra.mxu0 %v3895_v10 }
 0x293   : > { %2894 = vmatpush1.bf16.msra.mxu1 %v3898_v6 }
 0x295   : > { %3340 = vmatmul.mubr.msk.bf16.vlgmr.msra.gmra.mrb[16].mxu0 %vm4276_vm8, %v4649_v44 }
 0x296   : > { %3364 = vmatmul.mubr.msk.bf16.vlgmr.msra.gmra.mrb[8].mxu1 %vm4276_vm8, %v4649_v44  ;;  %3343 = vmatprep.mubr.msk.bf16.mxu0 %vm4390_vm11, %v4676_v63  ;;  %v1628_v44 = vsub.s32 2, %v4192_v17 }
 0x297   : > { %3367 = vmatprep.mubr.msk.bf16.mxu1 %vm4390_vm11, %v4676_v63 }
 0x298   : > { %v1629_v63 = vrot.slane %v1616_v32, %v1628_v44 }
 0x29d   : > { %3346 = vmatmul.mubr.msk.bf16.gmra.mrb[20].mxu0 %vm4390_vm11, %v4689_v5 }
 0x29e   : > { %3370 = vmatmul.mubr.msk.bf16.gmra.mrb[12].mxu1 %vm4390_vm11, %v4689_v5 }
 0x368   : > { %v2738_v12 = vpop.f32.mrb[16].mxu0 }
 0x369   : > { %v3391_v5 = vadd.f32 %v2738_v12, %v1621_v1  ;;  %v2897_v14 = vpop.f32.mrb[8].mxu1  ;;  %v2740_v17 = vpop.f32.mrb[17].mxu0 }
 0x36a   : > { %v3399_v56 = vadd.f32 %v2897_v14, %v1629_v63  ;;  %v3392_v18 = vadd.f32 %v2740_v17, %v1625_v51  ;;  %v2899_v15 = vpop.f32.mrb[9].mxu1  ;;  %v2742_v20 = vpop.f32.mrb[18].mxu0 }
 0x36b   : > { %2916 = vst [vmem:[%s5080_s22] sm:$0xff] %v3391_v5  ;;  %v3400_v16 = vadd.f32 %v2899_v15, %v1633_v13  ;;  %v3393_v52 = vadd.f32 %v2742_v20, %v1621_v1  ;;  %v2901_v19 = vpop.f32.mrb[10].mxu1  ;;  %v2744_v21 = vpop.f32.mrb[19].mxu0 }
 0x36c   : > { %2918 = vst [vmem:[%s5080_s22 + $0x10] sm:$0xff] %v3399_v56  ;;  %2917 = vst [vmem:[%s5080_s22 + $0x8] sm:$0xff] %v3392_v18  ;;  %v3401_v61 = vadd.f32 %v2901_v19, %v1629_v63  ;;  %v3394_v22 = vadd.f32 %v2744_v21, %v1625_v51  ;;  %v2903_v23 = vpop.f32.mrb[11].mxu1 }
 0x36d   : > { %2919 = vst [vmem:[%s5080_s22 + $0x18] sm:$0xff] %v3400_v16  ;;  %2920 = vst [vmem:[%s5080_s22 + $0x20] sm:$0xff] %v3393_v52  ;;  %v3402_v24 = vadd.f32 %v2903_v23, %v1633_v13 }
 0x36e   : > { %2922 = vst [vmem:[%s5080_s22 + $0x30] sm:$0xff] %v3401_v61  ;;  %2921 = vst [vmem:[%s5080_s22 + $0x28] sm:$0xff] %v3394_v22 }
 0x36f   : > { %2923 = vst [vmem:[%s5080_s22 + $0x38] sm:$0xff] %v3402_v24 }
 0x370   : > { %v2748_v25 = vpop.f32.mrb[20].mxu0 }
 0x371   : > { %v3395_v26 = vadd.f32 %v2748_v25, %v1621_v1  ;;  %v2907_v27 = vpop.f32.mrb[12].mxu1  ;;  %v2750_v28 = vpop.f32.mrb[21].mxu0 }
 0x372   : > { %v3403_v29 = vadd.f32 %v2907_v27, %v1629_v63  ;;  %v3396_v30 = vadd.f32 %v2750_v28, %v1625_v51  ;;  %v2909_v31 = vpop.f32.mrb[13].mxu1  ;;  %v2752_v33 = vpop.f32.mrb[22].mxu0 }
 0x373   : > { %2924 = vst [vmem:[%s5080_s22 + $0x40] sm:$0xff] %v3395_v26  ;;  %v3404_v34 = vadd.f32 %v2909_v31, %v1633_v13  ;;  %v3397_v35 = vadd.f32 %v2752_v33, %v1621_v1  ;;  %v2911_v36 = vpop.f32.mrb[14].mxu1  ;;  %v2754_v37 = vpop.f32.mrb[23].mxu0 }
 0x374   : > { %2926 = vst [vmem:[%s5080_s22 + $0x50] sm:$0xff] %v3403_v29  ;;  %2925 = vst [vmem:[%s5080_s22 + $0x48] sm:$0xff] %v3396_v30  ;;  %v3405_v38 = vadd.f32 %v2911_v36, %v1629_v63  ;;  %v3398_v40 = vadd.f32 %v2754_v37, %v1625_v51  ;;  %v2913_v41 = vpop.f32.mrb[15].mxu1 }
 0x375   : > { %2927 = vst [vmem:[%s5080_s22 + $0x58] sm:$0xff] %v3404_v34  ;;  %2928 = vst [vmem:[%s5080_s22 + $0x60] sm:$0xff] %v3397_v35  ;;  %v3406_v42 = vadd.f32 %v2913_v41, %v1633_v13 }
 0x376   : > { %2930 = vst [vmem:[%s5080_s22 + $0x70] sm:$0xff] %v3405_v38  ;;  %2929 = vst [vmem:[%s5080_s22 + $0x68] sm:$0xff] %v3398_v40 }
 0x377   : > { %2931 = vst [vmem:[%s5080_s22 + $0x78] sm:$0xff] %v3406_v42 }
 0x378 PF: > { %s17_s24 = sadd.s32 1, %s3907_s24  }
 0x379   : > { %p14_p4 = scmp.ge.s32.totalorder %s17_s24, 4  }
 0x37b   :  { %16 = sbr.rel (!%p14_p4) target bundleno = 1 (0x1), region = 78 }

</bundles_post_ra>
